<compile_context>
chip_gen: v7x
topology: tpu7x:2x2x1
jax: 0.10.0
libtpu: 0.0.40
codegen_flags: <defaults>
</compile_context>

<pallas_src>
import functools
import math

import jax
import jax.numpy as jnp
from jax import lax
from jax.experimental import pallas as pl
from jax.experimental.pallas import tpu as pltpu


def _mha_fused_kernel(q_ref, k_ref, v_ref, r_ref,
                      wq_ref, bq_ref, wk_ref, bk_ref, wv_ref, bv_ref,
                      scale_ref, shift_ref, o_ref, acc_ref,
                      *, num_heads, d_ker, d_v, inv_sqrt_dk, eps, feat,
                      compute_dtype):
    cdt = compute_dtype
    q = q_ref[0]          # (tq, E)  already compute_dtype
    k = k_ref[0]          # (S,  E)
    v = v_ref[0]          # (S,  E)

    # Fused projections for all heads at once (one MXU matmul per input,
    # fp32 accumulation; biases added once in fp32).
    Q = jnp.dot(q, wq_ref[...], preferred_element_type=jnp.float32) + bq_ref[...]
    K = jnp.dot(k, wk_ref[...], preferred_element_type=jnp.float32) + bk_ref[...]
    V = jnp.dot(v, wv_ref[...], preferred_element_type=jnp.float32) + bv_ref[...]
    # Fold the 1/sqrt(embed_dim) logit scale into Q (cheaper than scaling the
    # (tq, S) logits once per head).
    Q = Q * inv_sqrt_dk

    tq = Q.shape[0]
    ones_col = jnp.ones((tq, 1), jnp.float32)   # hoisted out of the head loop

    for h in range(num_heads):                  # H is small & compile-time
        Qh = Q[:, h * d_ker:(h + 1) * d_ker]    # (tq, d_ker) fp32, pre-scaled
        Kh = K[:, h * d_ker:(h + 1) * d_ker]    # (S,  d_ker) fp32
        Vh = V[:, h * d_v:(h + 1) * d_v]        # (S,  d_v)   fp32

        # Fold -0.5/sqrt(E) * |Kh|^2 into the QK^T matmul with an augmented
        # contraction column: [Qh, 1] . [Kh, -0.5*inv_sqrt*|Kh|^2].
        # The reference's -0.5*|Qh|^2 term is constant along the softmax key
        # axis and cancels exactly -> dropped.
        knorm = jnp.sum(Kh * Kh, axis=1, keepdims=True)              # (S, 1)
        q_aug = jnp.concatenate([Qh, ones_col], axis=1).astype(cdt)  # (tq, d_ker+1)
        k_aug = jnp.concatenate([Kh, (-0.5 * inv_sqrt_dk) * knorm],
                                axis=1).astype(cdt)                  # (S, d_ker+1)
        aw = lax.dot_general(q_aug, k_aug,
                             dimension_numbers=(((1,), (1,)), ((), ())),
                             preferred_element_type=jnp.float32)     # (tq, S)

        # Softmax over keys in fp32; approx reciprocal (EUP slot) for denom.
        aw = aw - jnp.max(aw, axis=-1, keepdims=True)
        p = jnp.exp(aw)
        p = p * pl.reciprocal(jnp.sum(p, axis=-1, keepdims=True), approx=True)

        # Write this head's result straight into its slab columns (no concat,
        # bounded live ranges across the unrolled head loop).
        acc_ref[:, h * d_v:(h + 1) * d_v] = jnp.dot(
            p.astype(cdt), Vh.astype(cdt), preferred_element_type=jnp.float32)

    # Residual add + custom LayerNorm, all statistics in fp32:
    #   scale * (x - mean) / (std_unbiased + eps + |shift|)
    x = acc_ref[...] + r_ref[0]                                   # (tq, E)
    mean = jnp.mean(x, axis=-1, keepdims=True)
    c = x - mean
    var = jnp.sum(c * c, axis=-1, keepdims=True) * (1.0 / (feat - 1))  # ddof=1
    div = jnp.sqrt(var) + eps + jnp.abs(shift_ref[...])
    o_ref[0] = (scale_ref[...] * c / div).astype(o_ref.dtype)


def _vmem_limit_bytes():
    """Raise the scoped-VMEM ceiling toward physical capacity (default is only
    16/32 MiB on v5e/v6e).  Safe fallback to the compiler default."""
    try:
        cap = pltpu.get_tpu_info().vmem_capacity_bytes
        return int(min(cap * 3 // 4, 96 * 1024 * 1024))
    except Exception:
        return None


def multi_head_attention(query, key, value, residual_x, params, *,
                         num_heads, d_ker, d_v, eps=1e-6,
                         q_block=256, compute_dtype=jnp.bfloat16):
    B, S, E = query.shape
    f32 = jnp.float32
    hdk = num_heads * d_ker
    hdv = num_heads * d_v
    assert hdv == E, "concat(heads) must equal embed_dim for the residual add"

    # Query-tile size: whole sequence at toy shapes, (8,128)-legal tiles else.
    tq = q_block if (S > q_block and S % q_block == 0 and q_block % 8 == 0) else S
    n_q = S // tq

    cdt = compute_dtype
    # Cast MXU operands once at the wrapper (also halves their DMA traffic);
    # biases, residual and LayerNorm params stay fp32.
    q_in = query.astype(cdt)
    k_in = key.astype(cdt)
    v_in = value.astype(cdt)
    wq = params["wq"].astype(cdt)
    wk = params["wk"].astype(cdt)
    wv = params["wv"].astype(cdt)

    qtile_spec = pl.BlockSpec((1, tq, E), lambda b, qi: (b, qi, 0))
    full_seq_spec = pl.BlockSpec((1, S, E), lambda b, qi: (b, 0, 0))
    const2d = lambda r, c: pl.BlockSpec((r, c), lambda b, qi: (0, 0))

    kernel = functools.partial(
        _mha_fused_kernel,
        num_heads=num_heads, d_ker=d_ker, d_v=d_v,
        inv_sqrt_dk=1.0 / math.sqrt(E),  # PyTorch divides by sqrt(self.d_k) == sqrt(embed_dim)
        eps=eps, feat=E, compute_dtype=cdt)

    return pl.pallas_call(
        kernel,
        out_shape=jax.ShapeDtypeStruct((B, S, E), f32),
        grid_spec=pltpu.PrefetchScalarGridSpec(
            num_scalar_prefetch=0,
            grid=(B, n_q),
            in_specs=[qtile_spec,                            # query     (q-tiled)
                      full_seq_spec,                         # key       (all keys)
                      full_seq_spec,                         # value
                      qtile_spec,                            # residual  (q-tiled)
                      const2d(E, hdk), const2d(1, hdk),      # wq, bq
                      const2d(E, hdk), const2d(1, hdk),      # wk, bk
                      const2d(E, hdv), const2d(1, hdv),      # wv, bv
                      const2d(1, E), const2d(1, E)],         # ln_scale, ln_shift
            out_specs=pl.BlockSpec((1, tq, E), lambda b, qi: (b, qi, 0)),
            scratch_shapes=[pltpu.VMEM((tq, E), jnp.float32)],
        ),
        compiler_params=pltpu.CompilerParams(
            dimension_semantics=("parallel", "parallel"),   # batch + q-tiles
            vmem_limit_bytes=_vmem_limit_bytes()),
    )(q_in, k_in, v_in, residual_x,
      wq, params["bq"], wk, params["bk"], wv, params["bv"],
      params["ln_scale"], params["ln_shift"])


def _reference(query, key, value, residual_x, params,
               *, num_heads, d_ker, d_v, eps=1e-6):
    """Plain-JAX replica of the PyTorch forward (keeps the |Q|^2 term)."""
    E = query.shape[-1]
    heads = []
    for h in range(num_heads):
        wq = params["wq"][:, h * d_ker:(h + 1) * d_ker]
        bq = params["bq"][0, h * d_ker:(h + 1) * d_ker]
        wk = params["wk"][:, h * d_ker:(h + 1) * d_ker]
        bk = params["bk"][0, h * d_ker:(h + 1) * d_ker]
        wv = params["wv"][:, h * d_v:(h + 1) * d_v]
        bv = params["bv"][0, h * d_v:(h + 1) * d_v]
        Q = query @ wq + bq
        K = key @ wk + bk
        V = value @ wv + bv
        aw = Q @ jnp.swapaxes(K, 1, 2)
        aw = aw - 0.5 * jnp.sum(Q * Q, axis=2, keepdims=True)
        aw = aw - 0.5 * jnp.swapaxes(jnp.sum(K * K, axis=2, keepdims=True), 1, 2)
        aw = aw / math.sqrt(E)
        aw = jax.nn.softmax(aw, axis=2)
        heads.append(aw @ V)
    x = jnp.concatenate(heads, axis=2) + residual_x
    mean = jnp.mean(x, axis=-1, keepdims=True)
    std = jnp.std(x, axis=-1, keepdims=True, ddof=1)
    div = std + eps + jnp.abs(params["ln_shift"][0])
    return params["ln_scale"][0] * (x - mean) / div


if __name__ == "__main__":
    B, S, E = 2, 8, 32          # batch, seq, embed_dim
    num_heads = 4
    d_ker = 16                  # d_k argument of MultiHeadAttention
    d_v = E // num_heads        # so that concat(heads) matches embed_dim

    key0 = jax.random.PRNGKey(0)
    ks = jax.random.split(key0, 12)
    f32 = jnp.float32

    query = jax.random.normal(ks[0], (B, S, E), f32)
    keyi = jax.random.normal(ks[1], (B, S, E), f32)
    value = jax.random.normal(ks[2], (B, S, E), f32)
    residual_x = jax.random.normal(ks[3], (B, S, E), f32)

    init = 1.0 / math.sqrt(E)
    # Per-head weights stacked column-wise: column block h*d -> (h+1)*d is
    # head h's W^T (so y = x @ W + b matches torch's x @ W_torch.T + b).
    params = {
        "wq": jax.random.uniform(ks[4], (E, num_heads * d_ker), f32, -init, init),
        "bq": jax.random.uniform(ks[5], (1, num_heads * d_ker), f32, -init, init),
        "wk": jax.random.uniform(ks[6], (E, num_heads * d_ker), f32, -init, init),
        "bk": jax.random.uniform(ks[7], (1, num_heads * d_ker), f32, -init, init),
        "wv": jax.random.uniform(ks[8], (E, num_heads * d_v), f32, -init, init),
        "bv": jax.random.uniform(ks[9], (1, num_heads * d_v), f32, -init, init),
        # LayerNorm params (torch init: scale=ones, shift=zeros)
        "ln_scale": jnp.ones((1, E), f32),
        "ln_shift": jnp.zeros((1, E), f32),
    }

    ref = _reference(query, keyi, value, residual_x, params,
                     num_heads=num_heads, d_ker=d_ker, d_v=d_v)

    # fp32 MXU path: identical math apart from the EUP approx reciprocal in
    # the softmax denominator (rel. err ~2^-12), hence the 1e-2 tolerance.
    out_f32 = multi_head_attention(query, keyi, value, residual_x, params,
                                   num_heads=num_heads, d_ker=d_ker, d_v=d_v,
                                   compute_dtype=jnp.float32)
    out_f32 = jax.block_until_ready(out_f32)
    assert out_f32.shape == (B, S, E)
    assert jnp.allclose(out_f32, ref, atol=1e-2, rtol=1e-2), "fp32 path mismatch"

    # bf16 MXU path (production default): fp32 accumulation and fp32
    # softmax/LayerNorm statistics, only operand rounding (~2^-9) remains.
    out_bf16 = multi_head_attention(query, keyi, value, residual_x, params,
                                    num_heads=num_heads, d_ker=d_ker, d_v=d_v,
                                    compute_dtype=jnp.bfloat16)
    out_bf16 = jax.block_until_ready(out_bf16)
    assert out_bf16.shape == (B, S, E)
    assert jnp.allclose(out_bf16, ref, atol=1e-1, rtol=1e-1), "bf16 path mismatch"

    print("KERNEL_OK")
</pallas_src>

<mosaic_0001>
module attributes {stable_mosaic.version = 11 : i64} {
  func.func @_mha_fused_kernel(%arg0: i32, %arg1: i32, %arg2: memref<1x8x32xf32, #tpu.memory_space<vmem>>, %arg3: memref<1x8x32xf32, #tpu.memory_space<vmem>>, %arg4: memref<1x8x32xf32, #tpu.memory_space<vmem>>, %arg5: memref<1x8x32xf32, #tpu.memory_space<vmem>>, %arg6: memref<32x64xf32, #tpu.memory_space<vmem>>, %arg7: memref<1x64xf32, #tpu.memory_space<vmem>>, %arg8: memref<32x64xf32, #tpu.memory_space<vmem>>, %arg9: memref<1x64xf32, #tpu.memory_space<vmem>>, %arg10: memref<32x32xf32, #tpu.memory_space<vmem>>, %arg11: memref<1x32xf32, #tpu.memory_space<vmem>>, %arg12: memref<1x32xf32, #tpu.memory_space<vmem>>, %arg13: memref<1x32xf32, #tpu.memory_space<vmem>>, %arg14: memref<1x8x32xf32, #tpu.memory_space<vmem>>, %arg15: memref<8x32xf32, #tpu.memory_space<vmem>>) attributes {dimension_semantics = [#tpu.dimension_semantics<parallel>, #tpu.dimension_semantics<parallel>], iteration_bounds = array<i64: 2, 1>, scalar_prefetch = 0 : i64, scratch_operands = 1 : i64, tpu.core_type = #tpu.core_type<tc>, window_params = [{transform_indices = @transform_0, window_bounds = array<i64: 1, 8, 32>}, {transform_indices = @transform_1, window_bounds = array<i64: 1, 8, 32>}, {transform_indices = @transform_2, window_bounds = array<i64: 1, 8, 32>}, {transform_indices = @transform_3, window_bounds = array<i64: 1, 8, 32>}, {pipeline_mode = #tpu.pipeline_mode<synchronous>, transform_indices = @transform_4, window_bounds = array<i64: 32, 64>}, {pipeline_mode = #tpu.pipeline_mode<synchronous>, transform_indices = @transform_5, window_bounds = array<i64: 1, 64>}, {pipeline_mode = #tpu.pipeline_mode<synchronous>, transform_indices = @transform_6, window_bounds = array<i64: 32, 64>}, {pipeline_mode = #tpu.pipeline_mode<synchronous>, transform_indices = @transform_7, window_bounds = array<i64: 1, 64>}, {pipeline_mode = #tpu.pipeline_mode<synchronous>, transform_indices = @transform_8, window_bounds = array<i64: 32, 32>}, {pipeline_mode = #tpu.pipeline_mode<synchronous>, transform_indices = @transform_9, window_bounds = array<i64: 1, 32>}, {pipeline_mode = #tpu.pipeline_mode<synchronous>, transform_indices = @transform_10, window_bounds = array<i64: 1, 32>}, {pipeline_mode = #tpu.pipeline_mode<synchronous>, transform_indices = @transform_11, window_bounds = array<i64: 1, 32>}, {transform_indices = @transform_12, window_bounds = array<i64: 1, 8, 32>}]} {
    %c0 = arith.constant 0 : index
    %c0_0 = arith.constant 0 : index
    %c0_1 = arith.constant 0 : index
    %0 = vector.load %arg2[%c0, %c0_0, %c0_1] : memref<1x8x32xf32, #tpu.memory_space<vmem>>, vector<1x8x32xf32>
    %1 = vector.shape_cast %0 : vector<1x8x32xf32> to vector<8x32xf32>
    %c0_2 = arith.constant 0 : index
    %c0_3 = arith.constant 0 : index
    %c0_4 = arith.constant 0 : index
    %2 = vector.load %arg3[%c0_2, %c0_3, %c0_4] : memref<1x8x32xf32, #tpu.memory_space<vmem>>, vector<1x8x32xf32>
    %3 = vector.shape_cast %2 : vector<1x8x32xf32> to vector<8x32xf32>
    %c0_5 = arith.constant 0 : index
    %c0_6 = arith.constant 0 : index
    %c0_7 = arith.constant 0 : index
    %4 = vector.load %arg4[%c0_5, %c0_6, %c0_7] : memref<1x8x32xf32, #tpu.memory_space<vmem>>, vector<1x8x32xf32>
    %5 = vector.shape_cast %4 : vector<1x8x32xf32> to vector<8x32xf32>
    %c0_8 = arith.constant 0 : index
    %c0_9 = arith.constant 0 : index
    %6 = vector.load %arg6[%c0_8, %c0_9] : memref<32x64xf32, #tpu.memory_space<vmem>>, vector<32x64xf32>
    %cst = arith.constant dense<0.000000e+00> : vector<8x64xf32>
    %7 = tpu.matmul %1, %6, %cst {dimension_numbers = #tpu.dot_dimension_numbers<[1], [0], [0], [1], [0, 0, 1, 1], [], []>} : vector<8x32xf32>, vector<32x64xf32>, vector<8x64xf32> -> vector<8x64xf32>
    %c0_10 = arith.constant 0 : index
    %c0_11 = arith.constant 0 : index
    %8 = vector.load %arg7[%c0_10, %c0_11] : memref<1x64xf32, #tpu.memory_space<vmem>>, vector<1x64xf32>
    %9 = vector.broadcast %8 : vector<1x64xf32> to vector<8x64xf32>
    %10 = arith.addf %7, %9 : vector<8x64xf32>
    %c0_12 = arith.constant 0 : index
    %c0_13 = arith.constant 0 : index
    %11 = vector.load %arg8[%c0_12, %c0_13] : memref<32x64xf32, #tpu.memory_space<vmem>>, vector<32x64xf32>
    %cst_14 = arith.constant dense<0.000000e+00> : vector<8x64xf32>
    %12 = tpu.matmul %3, %11, %cst_14 {dimension_numbers = #tpu.dot_dimension_numbers<[1], [0], [0], [1], [0, 0, 1, 1], [], []>} : vector<8x32xf32>, vector<32x64xf32>, vector<8x64xf32> -> vector<8x64xf32>
    %c0_15 = arith.constant 0 : index
    %c0_16 = arith.constant 0 : index
    %13 = vector.load %arg9[%c0_15, %c0_16] : memref<1x64xf32, #tpu.memory_space<vmem>>, vector<1x64xf32>
    %14 = vector.broadcast %13 : vector<1x64xf32> to vector<8x64xf32>
    %15 = arith.addf %12, %14 : vector<8x64xf32>
    %c0_17 = arith.constant 0 : index
    %c0_18 = arith.constant 0 : index
    %16 = vector.load %arg10[%c0_17, %c0_18] : memref<32x32xf32, #tpu.memory_space<vmem>>, vector<32x32xf32>
    %cst_19 = arith.constant dense<0.000000e+00> : vector<8x32xf32>
    %17 = tpu.matmul %5, %16, %cst_19 {dimension_numbers = #tpu.dot_dimension_numbers<[1], [0], [0], [1], [0, 0, 1, 1], [], []>} : vector<8x32xf32>, vector<32x32xf32>, vector<8x32xf32> -> vector<8x32xf32>
    %c0_20 = arith.constant 0 : index
    %c0_21 = arith.constant 0 : index
    %18 = vector.load %arg11[%c0_20, %c0_21] : memref<1x32xf32, #tpu.memory_space<vmem>>, vector<1x32xf32>
    %19 = vector.broadcast %18 : vector<1x32xf32> to vector<8x32xf32>
    %20 = arith.addf %17, %19 : vector<8x32xf32>
    %cst_22 = arith.constant 0.176776692 : f32
    %21 = vector.broadcast %cst_22 : f32 to vector<8x64xf32>
    %22 = arith.mulf %10, %21 : vector<8x64xf32>
    %cst_23 = arith.constant 1.000000e+00 : f32
    %23 = vector.broadcast %cst_23 : f32 to vector<8x1xf32>
    %24 = vector.extract_strided_slice %22 {offsets = [0, 0], sizes = [8, 16], strides = [1, 1]} : vector<8x64xf32> to vector<8x16xf32>
    %25 = vector.extract_strided_slice %15 {offsets = [0, 0], sizes = [8, 16], strides = [1, 1]} : vector<8x64xf32> to vector<8x16xf32>
    %26 = vector.extract_strided_slice %20 {offsets = [0, 0], sizes = [8, 8], strides = [1, 1]} : vector<8x32xf32> to vector<8x8xf32>
    %27 = arith.mulf %25, %25 : vector<8x16xf32>
    %cst_24 = arith.constant dense<0.000000e+00> : vector<8xf32>
    %28 = vector.multi_reduction <add>, %27, %cst_24 [1] : vector<8x16xf32> to vector<8xf32>
    %29 = vector.shape_cast %28 : vector<8xf32> to vector<8x1xf32>
    %30 = tpu.concatenate %24, %23 in 1 : vector<8x16xf32>, vector<8x1xf32> -> vector<8x17xf32>
    %cst_25 = arith.constant -0.0883883461 : f32
    %31 = vector.broadcast %cst_25 : f32 to vector<8x1xf32>
    %32 = arith.mulf %31, %29 : vector<8x1xf32>
    %33 = tpu.concatenate %25, %32 in 1 : vector<8x16xf32>, vector<8x1xf32> -> vector<8x17xf32>
    %cst_26 = arith.constant dense<0.000000e+00> : vector<8x8xf32>
    %34 = tpu.matmul %30, %33, %cst_26 {dimension_numbers = #tpu.dot_dimension_numbers<[1], [1], [0], [0], [0, 0, 1, 0], [], []>} : vector<8x17xf32>, vector<8x17xf32>, vector<8x8xf32> -> vector<8x8xf32>
    %cst_27 = arith.constant dense<0xFF800000> : vector<8xf32>
    %35 = vector.multi_reduction <maximumf>, %34, %cst_27 [1] : vector<8x8xf32> to vector<8xf32>
    %36 = vector.shape_cast %35 : vector<8xf32> to vector<8x1xf32>
    %37 = vector.broadcast %36 : vector<8x1xf32> to vector<8x8xf32>
    %38 = arith.subf %34, %37 : vector<8x8xf32>
    %39 = math.exp %38 : vector<8x8xf32>
    %cst_28 = arith.constant dense<0.000000e+00> : vector<8xf32>
    %40 = vector.multi_reduction <add>, %39, %cst_28 [1] : vector<8x8xf32> to vector<8xf32>
    %41 = vector.shape_cast %40 : vector<8xf32> to vector<8x1xf32>
    %42 = tpu.reciprocal %41 {approx = true} : vector<8x1xf32> -> vector<8x1xf32>
    %43 = vector.broadcast %42 : vector<8x1xf32> to vector<8x8xf32>
    %44 = arith.mulf %39, %43 : vector<8x8xf32>
    %cst_29 = arith.constant dense<0.000000e+00> : vector<8x8xf32>
    %45 = tpu.matmul %44, %26, %cst_29 {dimension_numbers = #tpu.dot_dimension_numbers<[1], [0], [0], [1], [0, 0, 1, 1], [], []>} : vector<8x8xf32>, vector<8x8xf32>, vector<8x8xf32> -> vector<8x8xf32>
    %c0_30 = arith.constant 0 : index
    %c0_31 = arith.constant 0 : index
    %46 = vector.load %arg15[%c0_30, %c0_31] : memref<8x32xf32, #tpu.memory_space<vmem>>, vector<8x8xf32>
    tpu.vector_store %arg15[%c0_30, %c0_31], %45 {strides = array<i32>} : memref<8x32xf32, #tpu.memory_space<vmem>>, vector<8x8xf32>,
    %47 = vector.extract_strided_slice %22 {offsets = [0, 16], sizes = [8, 16], strides = [1, 1]} : vector<8x64xf32> to vector<8x16xf32>
    %48 = vector.extract_strided_slice %15 {offsets = [0, 16], sizes = [8, 16], strides = [1, 1]} : vector<8x64xf32> to vector<8x16xf32>
    %49 = vector.extract_strided_slice %20 {offsets = [0, 8], sizes = [8, 8], strides = [1, 1]} : vector<8x32xf32> to vector<8x8xf32>
    %50 = arith.mulf %48, %48 : vector<8x16xf32>
    %cst_32 = arith.constant dense<0.000000e+00> : vector<8xf32>
    %51 = vector.multi_reduction <add>, %50, %cst_32 [1] : vector<8x16xf32> to vector<8xf32>
    %52 = vector.shape_cast %51 : vector<8xf32> to vector<8x1xf32>
    %53 = tpu.concatenate %47, %23 in 1 : vector<8x16xf32>, vector<8x1xf32> -> vector<8x17xf32>
    %cst_33 = arith.constant -0.0883883461 : f32
    %54 = vector.broadcast %cst_33 : f32 to vector<8x1xf32>
    %55 = arith.mulf %54, %52 : vector<8x1xf32>
    %56 = tpu.concatenate %48, %55 in 1 : vector<8x16xf32>, vector<8x1xf32> -> vector<8x17xf32>
    %cst_34 = arith.constant dense<0.000000e+00> : vector<8x8xf32>
    %57 = tpu.matmul %53, %56, %cst_34 {dimension_numbers = #tpu.dot_dimension_numbers<[1], [1], [0], [0], [0, 0, 1, 0], [], []>} : vector<8x17xf32>, vector<8x17xf32>, vector<8x8xf32> -> vector<8x8xf32>
    %cst_35 = arith.constant dense<0xFF800000> : vector<8xf32>
    %58 = vector.multi_reduction <maximumf>, %57, %cst_35 [1] : vector<8x8xf32> to vector<8xf32>
    %59 = vector.shape_cast %58 : vector<8xf32> to vector<8x1xf32>
    %60 = vector.broadcast %59 : vector<8x1xf32> to vector<8x8xf32>
    %61 = arith.subf %57, %60 : vector<8x8xf32>
    %62 = math.exp %61 : vector<8x8xf32>
    %cst_36 = arith.constant dense<0.000000e+00> : vector<8xf32>
    %63 = vector.multi_reduction <add>, %62, %cst_36 [1] : vector<8x8xf32> to vector<8xf32>
    %64 = vector.shape_cast %63 : vector<8xf32> to vector<8x1xf32>
    %65 = tpu.reciprocal %64 {approx = true} : vector<8x1xf32> -> vector<8x1xf32>
    %66 = vector.broadcast %65 : vector<8x1xf32> to vector<8x8xf32>
    %67 = arith.mulf %62, %66 : vector<8x8xf32>
    %cst_37 = arith.constant dense<0.000000e+00> : vector<8x8xf32>
    %68 = tpu.matmul %67, %49, %cst_37 {dimension_numbers = #tpu.dot_dimension_numbers<[1], [0], [0], [1], [0, 0, 1, 1], [], []>} : vector<8x8xf32>, vector<8x8xf32>, vector<8x8xf32> -> vector<8x8xf32>
    %c0_38 = arith.constant 0 : index
    %c8 = arith.constant 8 : index
    %69 = vector.load %arg15[%c0_38, %c8] : memref<8x32xf32, #tpu.memory_space<vmem>>, vector<8x8xf32>
    tpu.vector_store %arg15[%c0_38, %c8], %68 {strides = array<i32>} : memref<8x32xf32, #tpu.memory_space<vmem>>, vector<8x8xf32>,
    %70 = vector.extract_strided_slice %22 {offsets = [0, 32], sizes = [8, 16], strides = [1, 1]} : vector<8x64xf32> to vector<8x16xf32>
    %71 = vector.extract_strided_slice %15 {offsets = [0, 32], sizes = [8, 16], strides = [1, 1]} : vector<8x64xf32> to vector<8x16xf32>
    %72 = vector.extract_strided_slice %20 {offsets = [0, 16], sizes = [8, 8], strides = [1, 1]} : vector<8x32xf32> to vector<8x8xf32>
    %73 = arith.mulf %71, %71 : vector<8x16xf32>
    %cst_39 = arith.constant dense<0.000000e+00> : vector<8xf32>
    %74 = vector.multi_reduction <add>, %73, %cst_39 [1] : vector<8x16xf32> to vector<8xf32>
    %75 = vector.shape_cast %74 : vector<8xf32> to vector<8x1xf32>
    %76 = tpu.concatenate %70, %23 in 1 : vector<8x16xf32>, vector<8x1xf32> -> vector<8x17xf32>
    %cst_40 = arith.constant -0.0883883461 : f32
    %77 = vector.broadcast %cst_40 : f32 to vector<8x1xf32>
    %78 = arith.mulf %77, %75 : vector<8x1xf32>
    %79 = tpu.concatenate %71, %78 in 1 : vector<8x16xf32>, vector<8x1xf32> -> vector<8x17xf32>
    %cst_41 = arith.constant dense<0.000000e+00> : vector<8x8xf32>
    %80 = tpu.matmul %76, %79, %cst_41 {dimension_numbers = #tpu.dot_dimension_numbers<[1], [1], [0], [0], [0, 0, 1, 0], [], []>} : vector<8x17xf32>, vector<8x17xf32>, vector<8x8xf32> -> vector<8x8xf32>
    %cst_42 = arith.constant dense<0xFF800000> : vector<8xf32>
    %81 = vector.multi_reduction <maximumf>, %80, %cst_42 [1] : vector<8x8xf32> to vector<8xf32>
    %82 = vector.shape_cast %81 : vector<8xf32> to vector<8x1xf32>
    %83 = vector.broadcast %82 : vector<8x1xf32> to vector<8x8xf32>
    %84 = arith.subf %80, %83 : vector<8x8xf32>
    %85 = math.exp %84 : vector<8x8xf32>
    %cst_43 = arith.constant dense<0.000000e+00> : vector<8xf32>
    %86 = vector.multi_reduction <add>, %85, %cst_43 [1] : vector<8x8xf32> to vector<8xf32>
    %87 = vector.shape_cast %86 : vector<8xf32> to vector<8x1xf32>
    %88 = tpu.reciprocal %87 {approx = true} : vector<8x1xf32> -> vector<8x1xf32>
    %89 = vector.broadcast %88 : vector<8x1xf32> to vector<8x8xf32>
    %90 = arith.mulf %85, %89 : vector<8x8xf32>
    %cst_44 = arith.constant dense<0.000000e+00> : vector<8x8xf32>
    %91 = tpu.matmul %90, %72, %cst_44 {dimension_numbers = #tpu.dot_dimension_numbers<[1], [0], [0], [1], [0, 0, 1, 1], [], []>} : vector<8x8xf32>, vector<8x8xf32>, vector<8x8xf32> -> vector<8x8xf32>
    %c0_45 = arith.constant 0 : index
    %c16 = arith.constant 16 : index
    %92 = vector.load %arg15[%c0_45, %c16] : memref<8x32xf32, #tpu.memory_space<vmem>>, vector<8x8xf32>
    tpu.vector_store %arg15[%c0_45, %c16], %91 {strides = array<i32>} : memref<8x32xf32, #tpu.memory_space<vmem>>, vector<8x8xf32>,
    %93 = vector.extract_strided_slice %22 {offsets = [0, 48], sizes = [8, 16], strides = [1, 1]} : vector<8x64xf32> to vector<8x16xf32>
    %94 = vector.extract_strided_slice %15 {offsets = [0, 48], sizes = [8, 16], strides = [1, 1]} : vector<8x64xf32> to vector<8x16xf32>
    %95 = vector.extract_strided_slice %20 {offsets = [0, 24], sizes = [8, 8], strides = [1, 1]} : vector<8x32xf32> to vector<8x8xf32>
    %96 = arith.mulf %94, %94 : vector<8x16xf32>
    %cst_46 = arith.constant dense<0.000000e+00> : vector<8xf32>
    %97 = vector.multi_reduction <add>, %96, %cst_46 [1] : vector<8x16xf32> to vector<8xf32>
    %98 = vector.shape_cast %97 : vector<8xf32> to vector<8x1xf32>
    %99 = tpu.concatenate %93, %23 in 1 : vector<8x16xf32>, vector<8x1xf32> -> vector<8x17xf32>
    %cst_47 = arith.constant -0.0883883461 : f32
    %100 = vector.broadcast %cst_47 : f32 to vector<8x1xf32>
    %101 = arith.mulf %100, %98 : vector<8x1xf32>
    %102 = tpu.concatenate %94, %101 in 1 : vector<8x16xf32>, vector<8x1xf32> -> vector<8x17xf32>
    %cst_48 = arith.constant dense<0.000000e+00> : vector<8x8xf32>
    %103 = tpu.matmul %99, %102, %cst_48 {dimension_numbers = #tpu.dot_dimension_numbers<[1], [1], [0], [0], [0, 0, 1, 0], [], []>} : vector<8x17xf32>, vector<8x17xf32>, vector<8x8xf32> -> vector<8x8xf32>
    %cst_49 = arith.constant dense<0xFF800000> : vector<8xf32>
    %104 = vector.multi_reduction <maximumf>, %103, %cst_49 [1] : vector<8x8xf32> to vector<8xf32>
    %105 = vector.shape_cast %104 : vector<8xf32> to vector<8x1xf32>
    %106 = vector.broadcast %105 : vector<8x1xf32> to vector<8x8xf32>
    %107 = arith.subf %103, %106 : vector<8x8xf32>
    %108 = math.exp %107 : vector<8x8xf32>
    %cst_50 = arith.constant dense<0.000000e+00> : vector<8xf32>
    %109 = vector.multi_reduction <add>, %108, %cst_50 [1] : vector<8x8xf32> to vector<8xf32>
    %110 = vector.shape_cast %109 : vector<8xf32> to vector<8x1xf32>
    %111 = tpu.reciprocal %110 {approx = true} : vector<8x1xf32> -> vector<8x1xf32>
    %112 = vector.broadcast %111 : vector<8x1xf32> to vector<8x8xf32>
    %113 = arith.mulf %108, %112 : vector<8x8xf32>
    %cst_51 = arith.constant dense<0.000000e+00> : vector<8x8xf32>
    %114 = tpu.matmul %113, %95, %cst_51 {dimension_numbers = #tpu.dot_dimension_numbers<[1], [0], [0], [1], [0, 0, 1, 1], [], []>} : vector<8x8xf32>, vector<8x8xf32>, vector<8x8xf32> -> vector<8x8xf32>
    %c0_52 = arith.constant 0 : index
    %c24 = arith.constant 24 : index
    %115 = vector.load %arg15[%c0_52, %c24] : memref<8x32xf32, #tpu.memory_space<vmem>>, vector<8x8xf32>
    tpu.vector_store %arg15[%c0_52, %c24], %114 {strides = array<i32>} : memref<8x32xf32, #tpu.memory_space<vmem>>, vector<8x8xf32>,
    %c0_53 = arith.constant 0 : index
    %c0_54 = arith.constant 0 : index
    %116 = vector.load %arg15[%c0_53, %c0_54] : memref<8x32xf32, #tpu.memory_space<vmem>>, vector<8x32xf32>
    %c0_55 = arith.constant 0 : index
    %c0_56 = arith.constant 0 : index
    %c0_57 = arith.constant 0 : index
    %117 = vector.load %arg5[%c0_55, %c0_56, %c0_57] : memref<1x8x32xf32, #tpu.memory_space<vmem>>, vector<1x8x32xf32>
    %118 = vector.shape_cast %117 : vector<1x8x32xf32> to vector<8x32xf32>
    %119 = arith.addf %116, %118 : vector<8x32xf32>
    %cst_58 = arith.constant dense<0.000000e+00> : vector<8xf32>
    %120 = vector.multi_reduction <add>, %119, %cst_58 [1] : vector<8x32xf32> to vector<8xf32>
    %121 = vector.shape_cast %120 : vector<8xf32> to vector<8x1xf32>
    %cst_59 = arith.constant 3.200000e+01 : f32
    %122 = vector.broadcast %cst_59 : f32 to vector<8x1xf32>
    %123 = arith.divf %121, %122 : vector<8x1xf32>
    %124 = vector.broadcast %123 : vector<8x1xf32> to vector<8x32xf32>
    %125 = arith.subf %119, %124 : vector<8x32xf32>
    %126 = arith.mulf %125, %125 : vector<8x32xf32>
    %cst_60 = arith.constant dense<0.000000e+00> : vector<8xf32>
    %127 = vector.multi_reduction <add>, %126, %cst_60 [1] : vector<8x32xf32> to vector<8xf32>
    %128 = vector.shape_cast %127 : vector<8xf32> to vector<8x1xf32>
    %cst_61 = arith.constant 0.0322580636 : f32
    %129 = vector.broadcast %cst_61 : f32 to vector<8x1xf32>
    %130 = arith.mulf %128, %129 : vector<8x1xf32>
    %131 = math.sqrt %130 : vector<8x1xf32>
    %cst_62 = arith.constant 9.99999997E-7 : f32
    %132 = vector.broadcast %cst_62 : f32 to vector<8x1xf32>
    %133 = arith.addf %131, %132 : vector<8x1xf32>
    %c0_63 = arith.constant 0 : index
    %c0_64 = arith.constant 0 : index
    %134 = vector.load %arg13[%c0_63, %c0_64] : memref<1x32xf32, #tpu.memory_space<vmem>>, vector<1x32xf32>
    %135 = math.absf %134 : vector<1x32xf32>
    %136 = vector.broadcast %133 : vector<8x1xf32> to vector<8x32xf32>
    %137 = vector.broadcast %135 : vector<1x32xf32> to vector<8x32xf32>
    %138 = arith.addf %136, %137 : vector<8x32xf32>
    %c0_65 = arith.constant 0 : index
    %c0_66 = arith.constant 0 : index
    %139 = vector.load %arg12[%c0_65, %c0_66] : memref<1x32xf32, #tpu.memory_space<vmem>>, vector<1x32xf32>
    %140 = vector.broadcast %139 : vector<1x32xf32> to vector<8x32xf32>
    %141 = arith.mulf %140, %125 : vector<8x32xf32>
    %142 = arith.divf %141, %138 : vector<8x32xf32>
    %c0_67 = arith.constant 0 : index
    %c0_68 = arith.constant 0 : index
    %c0_69 = arith.constant 0 : index
    %143 = vector.load %arg14[%c0_67, %c0_68, %c0_69] : memref<1x8x32xf32, #tpu.memory_space<vmem>>, vector<1x8x32xf32>
    %144 = vector.shape_cast %143 : vector<1x8x32xf32> to vector<8x32xf32>
    %145 = vector.shape_cast %142 : vector<8x32xf32> to vector<1x8x32xf32>
    tpu.vector_store %arg14[%c0_67, %c0_68, %c0_69], %145 {strides = array<i32>} : memref<1x8x32xf32, #tpu.memory_space<vmem>>, vector<1x8x32xf32>,
    return
  }
  func.func @transform_0(%arg0: i32, %arg1: i32) -> (i32, i32, i32) {
    %c0_i32 = arith.constant 0 : i32
    %c0_i32_0 = arith.constant 0 : i32
    return %arg0, %arg1, %c0_i32 : i32, i32, i32
  }
  func.func @transform_1(%arg0: i32, %arg1: i32) -> (i32, i32, i32) {
    %c0_i32 = arith.constant 0 : i32
    %c0_i32_0 = arith.constant 0 : i32
    %c0_i32_1 = arith.constant 0 : i32
    return %arg0, %c0_i32, %c0_i32_0 : i32, i32, i32
  }
  func.func @transform_2(%arg0: i32, %arg1: i32) -> (i32, i32, i32) {
    %c0_i32 = arith.constant 0 : i32
    %c0_i32_0 = arith.constant 0 : i32
    %c0_i32_1 = arith.constant 0 : i32
    return %arg0, %c0_i32, %c0_i32_0 : i32, i32, i32
  }
  func.func @transform_3(%arg0: i32, %arg1: i32) -> (i32, i32, i32) {
    %c0_i32 = arith.constant 0 : i32
    %c0_i32_0 = arith.constant 0 : i32
    return %arg0, %arg1, %c0_i32 : i32, i32, i32
  }
  func.func @transform_4(%arg0: i32, %arg1: i32) -> (i32, i32) {
    %c0_i32 = arith.constant 0 : i32
    %c0_i32_0 = arith.constant 0 : i32
    %c0_i32_1 = arith.constant 0 : i32
    return %c0_i32, %c0_i32_0 : i32, i32
  }
  func.func @transform_5(%arg0: i32, %arg1: i32) -> (i32, i32) {
    %c0_i32 = arith.constant 0 : i32
    %c0_i32_0 = arith.constant 0 : i32
    %c0_i32_1 = arith.constant 0 : i32
    return %c0_i32, %c0_i32_0 : i32, i32
  }
  func.func @transform_6(%arg0: i32, %arg1: i32) -> (i32, i32) {
    %c0_i32 = arith.constant 0 : i32
    %c0_i32_0 = arith.constant 0 : i32
    %c0_i32_1 = arith.constant 0 : i32
    return %c0_i32, %c0_i32_0 : i32, i32
  }
  func.func @transform_7(%arg0: i32, %arg1: i32) -> (i32, i32) {
    %c0_i32 = arith.constant 0 : i32
    %c0_i32_0 = arith.constant 0 : i32
    %c0_i32_1 = arith.constant 0 : i32
    return %c0_i32, %c0_i32_0 : i32, i32
  }
  func.func @transform_8(%arg0: i32, %arg1: i32) -> (i32, i32) {
    %c0_i32 = arith.constant 0 : i32
    %c0_i32_0 = arith.constant 0 : i32
    %c0_i32_1 = arith.constant 0 : i32
    return %c0_i32, %c0_i32_0 : i32, i32
  }
  func.func @transform_9(%arg0: i32, %arg1: i32) -> (i32, i32) {
    %c0_i32 = arith.constant 0 : i32
    %c0_i32_0 = arith.constant 0 : i32
    %c0_i32_1 = arith.constant 0 : i32
    return %c0_i32, %c0_i32_0 : i32, i32
  }
  func.func @transform_10(%arg0: i32, %arg1: i32) -> (i32, i32) {
    %c0_i32 = arith.constant 0 : i32
    %c0_i32_0 = arith.constant 0 : i32
    %c0_i32_1 = arith.constant 0 : i32
    return %c0_i32, %c0_i32_0 : i32, i32
  }
  func.func @transform_11(%arg0: i32, %arg1: i32) -> (i32, i32) {
    %c0_i32 = arith.constant 0 : i32
    %c0_i32_0 = arith.constant 0 : i32
    %c0_i32_1 = arith.constant 0 : i32
    return %c0_i32, %c0_i32_0 : i32, i32
  }
  func.func @transform_12(%arg0: i32, %arg1: i32) -> (i32, i32, i32) {
    %c0_i32 = arith.constant 0 : i32
    %c0_i32_0 = arith.constant 0 : i32
    return %arg0, %arg1, %c0_i32 : i32, i32, i32
  }
}

</mosaic_0001>

<bundles_post_ra>
// kernel: tpu_custom_call.1
= control target key start
LH: loop header
LB: loop body
LE: loop exit
PB: predicated region body
PF: predicated region fallthrough
CT: control target
= control target key end

     0   :  { %s3011_s0 = inlined_call_operand.hbm [shape: f32[2,8,32], index: 0, kind: input, shape index: {}]   ;;  %s3012_s1 = inlined_call_operand.hbm [shape: f32[2,8,32], index: 1, kind: input, shape index: {}]   ;;  %s3013_s2 = inlined_call_operand.hbm [shape: f32[2,8,32], index: 2, kind: input, shape index: {}]   ;;  %s3014_s3 = inlined_call_operand.hbm [shape: f32[2,8,32], index: 3, kind: input, shape index: {}]   ;;  %s3015_s4 = inlined_call_operand.hbm [shape: f32[32,64], index: 4, kind: input, shape index: {}]   ;;  %s3016_s5 = inlined_call_operand.vmem [shape: f32[1,64], index: 5, kind: input, shape index: {}]   ;;  %s3017_s6 = inlined_call_operand.hbm [shape: f32[32,64], index: 6, kind: input, shape index: {}]   ;;  %s3018_s7 = inlined_call_operand.vmem [shape: f32[1,64], index: 7, kind: input, shape index: {}]   ;;  %s3019_s8 = inlined_call_operand.hbm [shape: f32[32,32], index: 8, kind: input, shape index: {}]   ;;  %s3020_s9 = inlined_call_operand.vmem [shape: f32[1,32], index: 9, kind: input, shape index: {}]   ;;  %s3021_s10 = inlined_call_operand.vmem [shape: f32[1,32], index: 10, kind: input, shape index: {}]   ;;  %s3022_s11 = inlined_call_operand.vmem [shape: f32[1,32], index: 11, kind: input, shape index: {}]   ;;  %s3023_s12 = inlined_call_operand.hbm [shape: f32[2,8,32], index: 12, kind: output, shape index: {}]  }
   0x1   :  { %3044 = sst [smem:[#allocation29_spill]] %s3011_s0 }
   0x2   :  { %3045 = sst [smem:[#allocation30_spill]] %s3012_s1 }
   0x3   :  { %3046 = sst [smem:[#allocation31_spill]] %s3015_s4 }
   0x4   :  { %3047 = sst [smem:[#allocation32_spill]] %s3017_s6 }
   0x5   :  { %3048 = sst [smem:[#allocation33_spill]] %s3020_s9 }
   0x6   :  { %3049 = sst [smem:[#allocation34_spill]] %s3021_s10 }
   0x7   :  { %3050 = sst [smem:[#allocation35_spill]] %s3022_s11 }
   0x8   :  { %3051 = sst [smem:[#allocation36_spill]] %s3023_s12 }
   0x9   :  { %17 = vsyncpa [#allocation4], 0 }
   0xa   :  { %19 = vsyncpa [#allocation4 + $0x1], 0 }
   0xb   :  { %20 = vsyncpa [#allocation7], 0 }
   0xc   :  { %22 = vsyncpa [#allocation7 + $0x1], 0 }
   0xd   :  { %23 = vsyncpa [#allocation10], 0 }
   0xe   :  { %25 = vsyncpa [#allocation10 + $0x1], 0 }
   0xf   :  { %26 = vsyncpa [#allocation13], 0 }
  0x10   :  { %27 = vsyncpa [#allocation5], 0 }
  0x11   :  { %29 = vsyncpa [#allocation5 + $0x1], 0  ;;  %s2516_s21 = smov 0   ;;  %s2518_s22 = smov 0  }
  0x12   :  { %s2520_s23 = smov 0   ;;  %s2522_s24 = smov 0  }
  0x13   :  { %s2524_s25 = smov 0   ;;  %s2526_s26 = smov 0  }
  0x14 LB: > { %3052 = sst [smem:[#allocation22_spill]] %s2408_s21  ;;  %s2547_s27 = sadd.s32 4294967295, %s2428_s26   ;;  %s2428_s26 = sphi %s2526_s26, %s35_s26   ;;  %s2424_s25 = sphi %s2524_s25, %s3100_s25   ;;  %s2420_s24 = sphi %s2522_s24, %s3099_s24   ;;  %s2416_s23 = sphi %s2520_s23, %s3103_s23   ;;  %s2412_s22 = sphi %s2518_s22, %s3102_s22   ;;  %s2408_s21 = sphi %s2516_s21, %s3101_s21  }
  0x15   : > { %3053 = sst [smem:[#allocation23_spill]] %s2420_s24  ;;  %s1817_s28 = sadd.s32 4294967294, %s2428_s26  }
  0x16   : > { %3054 = sst [smem:[#allocation24_spill]] %s2424_s25  ;;  %p69_p0 = scmp.ne.s32.totalorder %s2412_s22, %s2408_s21 }
  0x17   : > { %p3027_p1 = scmp.eq.s32.totalorder %s2547_s27, 0  ;;  %p349_p3 = scmp.eq.s32.totalorder %s1817_s28, 1 }
  0x18   : > { %p1818_p5 = scmp.ge.s32.totalorder %s2428_s26, 1  ;;  %p356_p7 = scmp.lt.s32.totalorder %s2428_s26, 3 }
  0x19   : > { %p2556_p4 = por %p3027_p1, %p69_p0  ;;  %p2561_p6 = por %p349_p3, %p69_p0 }
  0x1a   : > { %p2566_p8 = pnand %p1818_p5, %p356_p7  ;;  %s2430_s14 = smov [#allocation11]  }
  0x1b   : > { %s3055_s29 = scalar_select %p2556_p4, 1, 0 }
  0x1c   : > { %s3056_s30 = scalar_select %p2561_p6, 1, 0 }
  0x1d   : > { %s3058_s13 = scalar_select %p2566_p8, 1, 0 }
  0x1e   : > { %3057 = sst [smem:[#allocation25_spill]] %s3056_s30  ;;  %s368_s15 = sshll.u32 %s2430_s14, 4  ;;  %s2570_s15 = int_to_ptr.vmem [resolvable:$true] %s368_s15 }
  0x1f   : > { %p2007_p9 = pneg %p2566_p8  ;;  %s2431_s17 = smov [#allocation12]  }
  0x20   : > { %s384_s18 = sshll.u32 %s2431_s17, 4  ;;  %s3060_s4 = sld [smem:[#allocation31_spill]]  ;;  %s2581_s18 = int_to_ptr.vmem [resolvable:$true] %s384_s18 }
  0x21   : > { %p2577_p11 = pnand %p2007_p9, %p3027_p1 }
  0x23   : > { %s3059_s16 = scalar_select %p2577_p11, 1, 0 }
  0x24   : > { %p2591_p13 = pneg %p2577_p11 }
  0x26   : > { %s2126_s28 = scalar_lea.hbm %s3060_s4, 512 }
  0x27   : > { %p2127_p12 = scmp.ne.s32.totalorder %s3060_s4, %s2126_s28  ;;  %p2133_p5 = scmp.lt.u32.totalorder %s2126_s28, %s3060_s4 }
  0x28   : > { %s3061_s21 = scalar_select %p2591_p13, 1, 0 }
  0x29   : > { %p2129_p0 = pnand %p2591_p13, %p2127_p12 }
  0x2b   : > { %p2130_p3 = pneg %p2129_p0 }
  0x2d   : > { %p2135_p7 = pnand %p2133_p5, %p2130_p3 }
  0x2f   : > { %2138 = shalt.err (!%p2135_p7)
}
  0x30   : > { %s2139_s30 = scalar_lea.vmem %s2570_s15, 512  ;;  %p2147_p2 = scmp.lt.s32.totalorder %s2570_s15, %s2570_s15 }
  0x31   : > { %p2140_p9 = scmp.ne.s32.totalorder %s2570_s15, %s2139_s30  ;;  %p2148_p6 = scmp.lt.s32.totalorder %s2139_s30, %s2139_s30 }
  0x33   : > { %p2142_p10 = pnand %p2140_p9, %p2591_p13  ;;  %p2149_p12 = por %p2148_p6, %p2147_p2 }
  0x35   : > { %p2143_p1 = pneg %p2142_p10 }
  0x37   : > { %p2150_p0 = pnand %p2149_p12, %p2143_p1 }
  0x39   : > { %2153 = shalt.err (!%p2150_p0)
}
  0x3a   : > { %s3028_s19 = smov 128   ;;  %s3029_s12 = smov 8  }
  0x3b   : > { %2010 = dma.hbm_to_vmem [thread:$0]  (!%p2577_p11), %s3060_s4, 512, %s2570_s15, [#allocation10], %s3028_s19, %s3028_s19, %s3029_s12  }
  0x3c   : > { %s3062_s6 = sld [smem:[#allocation32_spill]] }
  0x42   : > { %s2154_s30 = scalar_lea.hbm %s3062_s6, 512 }
  0x43   : > { %p2155_p1 = scmp.ne.s32.totalorder %s3062_s6, %s2154_s30  ;;  %p2161_p10 = scmp.lt.u32.totalorder %s2154_s30, %s3062_s6 }
  0x45   : > { %p2157_p2 = pnand %p2155_p1, %p2591_p13 }
  0x47   : > { %p2158_p6 = pneg %p2157_p2 }
  0x49   : > { %p2163_p3 = pnand %p2161_p10, %p2158_p6 }
  0x4b   : > { %2166 = shalt.err (!%p2163_p3)
}
  0x4c   : > { %s2167_s15 = scalar_lea.vmem %s2581_s18, 512  ;;  %p2175_p12 = scmp.lt.s32.totalorder %s2581_s18, %s2581_s18 }
  0x4d   : > { %p2168_p5 = scmp.ne.s32.totalorder %s2581_s18, %s2167_s15  ;;  %p2176_p0 = scmp.lt.s32.totalorder %s2167_s15, %s2167_s15 }
  0x4f   : > { %p2170_p7 = pnand %p2168_p5, %p2591_p13  ;;  %p2177_p1 = por %p2176_p0, %p2175_p12 }
  0x51   : > { %p2171_p9 = pneg %p2170_p7 }
  0x53   : > { %p2178_p2 = pnand %p2177_p1, %p2171_p9 }
  0x55   : > { %2181 = shalt.err (!%p2178_p2)
}
  0x56   : > { %2013 = dma.hbm_to_vmem [thread:$0]  (!%p2577_p11), %s3062_s6, 512, %s2581_s18, [#allocation13], %s3028_s19, %s3028_s19, %s3029_s12  }
  0x57   : > { %s47_s11 = sadd.s32 1, %s2424_s25  ;;  %s56_s24 = sadd.s32 1, %s2416_s23 }
  0x58   : > { %p49_p6 = scmp.ge.s32.totalorder %s47_s11, 2  ;;  %p63_p10 = scmp.ne.s32.totalorder %s2416_s23, %s2412_s22 }
  0x59   : > { %p64_p3 = scmp.eq.s32.totalorder %s2428_s26, 0  ;;  %p2037_p5 = scmp.lt.s32.totalorder %s2428_s26, 2 }
  0x5a   : > { %s3105_s11 = smov (%p49_p6, %s47_s11), 0  ;;  %p3064_p9 = scmp.eq.s32.totalorder %s2547_s27, 1 }
  0x5b   : > { %3063 = sst [smem:[#allocation26_spill]] %s3105_s11  ;;  %p65_p7 = por %p64_p3, %p63_p10 }
  0x5c   : > { %p2651_p12 = por %p3064_p9, %p63_p10  ;;  %s51_s28 = ssub.s32 %s2424_s25, %s3105_s11 }
  0x5d   : > { %s3030_s18 = sand.u32 1, %s2416_s23   ;;  %p54_p0 = scmp.eq.s32.totalorder %s51_s28, 0 }
  0x5e   : > { %s3065_s20 = scalar_select %p2651_p12, 1, 0 }
  0x5f   : > { %s2660_s14 = sshll.u32 %s3030_s18, 3  ;;  %s2663_s17 = sshll.u32 %s2424_s25, 7 }
  0x60   : > { %3066 = sst [smem:[#allocation27_spill]] %s3065_s20  ;;  %p2665_p1 = pnand %p2037_p5, %p65_p7 }
  0x61   : > { %s2670_s15 = scalar_select %p54_p0, %s2416_s23, %s56_s24  }
  0x62   : > { %s3067_s30 = scalar_select %p2665_p1, 1, 0 }
  0x63   : > { %3068 = sst [smem:[#allocation28_spill]] %s2670_s15  ;;  %s3035_s9 = sand.u32 1, %s2428_s26  }
  0x64   : > { %s3069_s1 = sld [smem:[#allocation30_spill]]  ;;  %s446_s28 = scalar_lea.vmem [#allocation6], %s2660_s14 }
  0x65   : > { %s453_s18 = sshll.u32 %s446_s28, 4  ;;  %s2684_s4 = scalar_lea.sflag [#allocation7], %s3035_s9  ;;  %s2680_s18 = int_to_ptr.vmem [resolvable:$true] %s453_s18 }
  0x66   : > { %p2690_p6 = pneg %p2665_p1 }
  0x6a   : > { %s2677_s12 = scalar_lea.hbm %s3069_s1, %s2663_s17  ;;  %s2187_s28 = scalar_lea.hbm %s3069_s1, 256 }
  0x6b   : > { %s2182_s6 = scalar_lea.hbm %s2677_s12, 128  ;;  %p2188_p5 = scmp.lt.u32.totalorder %s2677_s12, %s3069_s1 }
  0x6c   : > { %p2183_p2 = scmp.ne.s32.totalorder %s2677_s12, %s2182_s6  ;;  %p2189_p7 = scmp.lt.u32.totalorder %s2187_s28, %s2182_s6 }
  0x6d   : > { %p2191_p0 = scmp.lt.u32.totalorder %s2182_s6, %s2677_s12 }
  0x6e   : > { %p2185_p10 = pnand %p2690_p6, %p2183_p2  ;;  %p2190_p9 = por %p2189_p7, %p2188_p5 }
  0x70   : > { %p2186_p3 = pneg %p2185_p10  ;;  %p2192_p12 = por %p2191_p0, %p2190_p9 }
  0x72   : > { %p2193_p4 = pnand %p2192_p12, %p2186_p3 }
  0x74   : > { %2196 = shalt.err (!%p2193_p4)
}
  0x75   : > { %s2197_s9 = scalar_lea.vmem %s2680_s18, 128  ;;  %s2434_s19 = smov [#allocation6]  }
  0x76   : > { %p2198_p2 = scmp.ne.s32.totalorder %s2680_s18, %s2197_s9  ;;  %s2202_s10 = sshll.u32 %s2434_s19, 4  ;;  %s2203_s10 = int_to_ptr.vmem [resolvable:$false] %s2202_s10 }
  0x77   : > { %s2204_s25 = scalar_lea.vmem %s2203_s10, 256  ;;  %p2205_p11 = scmp.lt.s32.totalorder %s2680_s18, %s2203_s10 }
  0x78   : > { %p2200_p10 = pnand %p2198_p2, %p2690_p6  ;;  %p2206_p13 = scmp.lt.s32.totalorder %s2204_s25, %s2197_s9 }
  0x7a   : > { %p2201_p8 = pneg %p2200_p10  ;;  %p2207_p5 = por %p2206_p13, %p2205_p11 }
  0x7c   : > { %p2208_p7 = pnand %p2207_p5, %p2201_p8 }
  0x7e   : > { %2211 = shalt.err (!%p2208_p7)
}
  0x7f   : > { %2023 = dma.hbm_to_vmem [thread:$0]  (!%p2665_p1), %s2677_s12, 128, %s2680_s18, %s2684_s4  }
  0x80   : > { %s2435_s6 = smov [#allocation14]   ;;  %s3071_s0 = sld [smem:[#allocation29_spill]] }
  0x81   : > { %s400_s11 = sshll.u32 %s2435_s6, 4  ;;  %s2212_s25 = scalar_lea.hbm %s3019_s8, 512  ;;  %s401_s11 = int_to_ptr.vmem [resolvable:$true] %s400_s11 }
  0x82   : > { %p2213_p4 = scmp.ne.s32.totalorder %s3019_s8, %s2212_s25  ;;  %p3072_p8 = scmp.ne.s32.totalorder %s3061_s21, 0 }
  0x83   : > { %p2219_p12 = scmp.lt.u32.totalorder %s2212_s25, %s3019_s8 }
  0x84   : > { %p2215_p11 = pnand %p2213_p4, %p3072_p8 }
  0x86   : > { %s2718_s1 = scalar_lea.hbm %s3071_s0, %s2663_s17  ;;  %p2216_p13 = pneg %p2215_p11 }
  0x88   : > { %p2221_p3 = pnand %p2219_p12, %p2216_p13 }
  0x8a   : > { %2224 = shalt.err (!%p2221_p3)
}
  0x8b   : > { %s2225_s6 = scalar_lea.vmem %s401_s11, 512  ;;  %p2233_p10 = scmp.lt.s32.totalorder %s401_s11, %s401_s11 }
  0x8c   : > { %p2226_p9 = scmp.ne.s32.totalorder %s401_s11, %s2225_s6  ;;  %p2234_p5 = scmp.lt.s32.totalorder %s2225_s6, %s2225_s6 }
  0x8e   : > { %p2228_p0 = pnand %p2226_p9, %p3072_p8  ;;  %p2235_p7 = por %p2234_p5, %p2233_p10 }
  0x90   : > { %p2229_p2 = pneg %p2228_p0 }
  0x92   : > { %p2236_p1 = pnand %p2235_p7, %p2229_p2 }
  0x94   : > { %2239 = shalt.err (!%p2236_p1)
}
  0x95   : > { %p3073_p4 = scmp.ne.s32.totalorder %s3059_s16, 0  ;;  %s3074_s20 = smov 8  }
  0x96   : > { %s3075_s15 = smov 128   ;;  %s427_s21 = scalar_lea.vmem [#allocation3], %s2660_s14 }
  0x97   : > { %2016 = dma.hbm_to_vmem [thread:$0]  (!%p3073_p4), %s3019_s8, 512, %s401_s11, [#allocation13], %s3075_s15, %s3075_s15, %s3074_s20  }
  0x98   : > { %s435_s9 = sshll.u32 %s427_s21, 4  ;;  %s2748_s25 = scalar_lea.hbm %s3013_s2, %s2663_s17  ;;  %s2742_s9 = int_to_ptr.vmem [resolvable:$true] %s435_s9 }
  0x99   : > { %s3076_s12 = sand.u32 1, %s2416_s23   ;;  %s2240_s6 = scalar_lea.hbm %s2718_s1, 128 }
  0x9a   : > { %s424_s18 = scalar_lea.sflag [#allocation4], %s3076_s12  ;;  %p2241_p1 = scmp.ne.s32.totalorder %s2718_s1, %s2240_s6 }
  0x9b   : > { %s2245_s11 = scalar_lea.hbm %s3071_s0, 256  ;;  %p2246_p13 = scmp.lt.u32.totalorder %s2718_s1, %s3071_s0 }
  0x9c   : > { %p2243_p8 = pnand %p2241_p1, %p2690_p6  ;;  %p2247_p12 = scmp.lt.u32.totalorder %s2245_s11, %s2240_s6 }
  0x9d   : > { %p2249_p9 = scmp.lt.u32.totalorder %s2240_s6, %s2718_s1 }
  0x9e   : > { %p2244_p11 = pneg %p2243_p8  ;;  %p2248_p3 = por %p2247_p12, %p2246_p13 }
  0xa0   : > { %p2250_p0 = por %p2249_p9, %p2248_p3 }
  0xa2   : > { %p2251_p2 = pnand %p2250_p0, %p2244_p11 }
  0xa4   : > { %2254 = shalt.err (!%p2251_p2)
}
  0xa5   : > { %s2255_s21 = scalar_lea.vmem %s2742_s9, 128  ;;  %s2436_s16 = smov [#allocation3]  }
  0xa6   : > { %p2256_p10 = scmp.ne.s32.totalorder %s2742_s9, %s2255_s21  ;;  %s2260_s10 = sshll.u32 %s2436_s16, 4  ;;  %s2261_s10 = int_to_ptr.vmem [resolvable:$false] %s2260_s10 }
  0xa7   : > { %s2262_s12 = scalar_lea.vmem %s2261_s10, 256  ;;  %p2263_p4 = scmp.lt.s32.totalorder %s2742_s9, %s2261_s10 }
  0xa8   : > { %p2258_p5 = pnand %p2256_p10, %p2690_p6  ;;  %p2264_p1 = scmp.lt.s32.totalorder %s2262_s12, %s2255_s21 }
  0xaa   : > { %p2259_p7 = pneg %p2258_p5  ;;  %p2265_p8 = por %p2264_p1, %p2263_p4 }
  0xac   : > { %p2266_p13 = pnand %p2265_p8, %p2259_p7 }
  0xae   : > { %2269 = shalt.err (!%p2266_p13)
}
  0xaf   : > { %p3077_p11 = scmp.ne.s32.totalorder %s3067_s30, 0  ;;  %s464_s6 = scalar_lea.vmem [#allocation8], %s2660_s14 }
  0xb0   : > { %s471_s28 = sshll.u32 %s464_s6, 4  ;;  %s2778_s20 = scalar_lea.hbm %s3014_s3, %s2663_s17  ;;  %s472_s28 = int_to_ptr.vmem [resolvable:$true] %s471_s28 }
  0xb1   : > { %2020 = dma.hbm_to_vmem [thread:$0]  (!%p3077_p11), %s2718_s1, 128, %s2742_s9, %s424_s18  }
  0xb2   : > { %s2270_s15 = scalar_lea.hbm %s2748_s25, 128  ;;  %s2275_s10 = scalar_lea.hbm %s3013_s2, 256 }
  0xb3   : > { %p2271_p12 = scmp.ne.s32.totalorder %s2748_s25, %s2270_s15  ;;  %p2276_p0 = scmp.lt.u32.totalorder %s2748_s25, %s3013_s2 }
  0xb4   : > { %p2277_p2 = scmp.lt.u32.totalorder %s2275_s10, %s2270_s15  ;;  %p2279_p5 = scmp.lt.u32.totalorder %s2270_s15, %s2748_s25 }
  0xb5   : > { %p2273_p3 = pnand %p2271_p12, %p2690_p6 }
  0xb6   : > { %p2278_p10 = por %p2277_p2, %p2276_p0 }
  0xb7   : > { %p2274_p9 = pneg %p2273_p3 }
  0xb8   : > { %p2280_p7 = por %p2279_p5, %p2278_p10 }
  0xba   : > { %p2281_p4 = pnand %p2280_p7, %p2274_p9 }
  0xbc   : > { %2284 = shalt.err (!%p2281_p4)
}
  0xbd   : > { %s2285_s1 = scalar_lea.vmem %s472_s28, 128  ;;  %s2437_s17 = smov [#allocation8]  }
  0xbe   : > { %p2286_p1 = scmp.ne.s32.totalorder %s472_s28, %s2285_s1  ;;  %s2290_s9 = sshll.u32 %s2437_s17, 4  ;;  %s2291_s9 = int_to_ptr.vmem [resolvable:$false] %s2290_s9 }
  0xbf   : > { %s2292_s18 = scalar_lea.vmem %s2291_s9, 256  ;;  %p2293_p12 = scmp.lt.s32.totalorder %s472_s28, %s2291_s9 }
  0xc0   : > { %p2288_p8 = pnand %p2286_p1, %p2690_p6  ;;  %p2294_p3 = scmp.lt.s32.totalorder %s2292_s18, %s2285_s1 }
  0xc2   : > { %p2289_p13 = pneg %p2288_p8  ;;  %p2295_p11 = por %p2294_p3, %p2293_p12 }
  0xc4   : > { %p2296_p0 = pnand %p2295_p11, %p2289_p13 }
  0xc6   : > { %2299 = shalt.err (!%p2296_p0)
}
  0xc7   : > { %p3078_p2 = scmp.ne.s32.totalorder %s3067_s30, 0  ;;  %s482_s0 = scalar_lea.vmem [#allocation9], %s2660_s14 }
  0xc8   : > { %s490_s6 = sshll.u32 %s482_s0, 4  ;;  %s3079_s19 = sand.u32 1, %s2428_s26   ;;  %s491_s6 = int_to_ptr.vmem [resolvable:$true] %s490_s6 }
  0xc9   : > { %2026 = dma.hbm_to_vmem [thread:$0]  (!%p3078_p2), %s2748_s25, 128, %s472_s28, %s2684_s4  }
  0xca   : > { %s479_s11 = scalar_lea.sflag [#allocation10], %s3079_s19  ;;  %s2300_s15 = scalar_lea.hbm %s2778_s20, 128 }
  0xcb   : > { %p2301_p11 = scmp.ne.s32.totalorder %s2778_s20, %s2300_s15  ;;  %s2305_s10 = scalar_lea.hbm %s3014_s3, 256 }
  0xcc   : > { %p2306_p5 = scmp.lt.u32.totalorder %s2778_s20, %s3014_s3  ;;  %p2307_p7 = scmp.lt.u32.totalorder %s2305_s10, %s2300_s15 }
  0xcd   : > { %p2303_p9 = pnand %p2301_p11, %p2690_p6  ;;  %p2309_p1 = scmp.lt.u32.totalorder %s2300_s15, %s2778_s20 }
  0xce   : > { %p2308_p4 = por %p2307_p7, %p2306_p5 }
  0xcf   : > { %p2304_p10 = pneg %p2303_p9 }
  0xd0   : > { %p2310_p8 = por %p2309_p1, %p2308_p4 }
  0xd2   : > { %p2311_p13 = pnand %p2310_p8, %p2304_p10 }
  0xd4   : > { %2314 = shalt.err (!%p2311_p13)
}
  0xd5   : > { %s2315_s4 = scalar_lea.vmem %s491_s6, 128  ;;  %s2438_s14 = smov [#allocation9]  }
  0xd6   : > { %p2316_p12 = scmp.ne.s32.totalorder %s491_s6, %s2315_s4  ;;  %s2320_s25 = sshll.u32 %s2438_s14, 4  ;;  %s2321_s25 = int_to_ptr.vmem [resolvable:$false] %s2320_s25 }
  0xd7   : > { %s2322_s28 = scalar_lea.vmem %s2321_s25, 256  ;;  %p2323_p11 = scmp.lt.s32.totalorder %s491_s6, %s2321_s25 }
  0xd8   : > { %p2318_p3 = pnand %p2316_p12, %p2690_p6  ;;  %p2324_p9 = scmp.lt.s32.totalorder %s2322_s28, %s2315_s4 }
  0xda   : > { %p2319_p0 = pneg %p2318_p3  ;;  %p2325_p2 = por %p2324_p9, %p2323_p11 }
  0xdc   : > { %p2326_p5 = pnand %p2325_p2, %p2319_p0 }
  0xde   : > { %2329 = shalt.err (!%p2326_p5)
}
  0xdf   : > { %p3080_p7 = scmp.ne.s32.totalorder %s3067_s30, 0  ;;  %p3081_p10 = scmp.ne.s32.totalorder %s3058_s13, 0 }
  0xe0   : > { %s2821_s24 = sand.u32 (!%p3081_p10), 1, %s2412_s22   ;;  %p3082_p6 = scmp.ne.s32.totalorder (!%p3081_p10), %s3055_s29, 0 }
  0xe1   : > { %2029 = dma.hbm_to_vmem [thread:$0]  (!%p3080_p7), %s2778_s20, 128, %s491_s6, %s479_s11  }
  0xe2   : > { %499 = sbr.rel (%p3081_p10) target bundleno = 1992 (0x7c8), region = 68  ;;  %s2824_s17 = sshll.u32 (!%p3081_p10), %s2821_s24, 3 }
  0xe3   : > { %s502_s9 = scalar_lea.sflag (!%p3081_p10), [#allocation4], %s2821_s24  ;;  %s505_s18 = scalar_lea.vmem (!%p3081_p10), [#allocation3], %s2824_s17 }
  0xe9   : > { %2383 = dma.done.wait (%p3082_p6), %s502_s9, 128  }
  0xea   : > { %2385 = vsyncadd (%p3082_p6), %s502_s9, 4294967168  ;;  %s510_s13 = sand.u32 1, %s2547_s27   ;;  %s514_s20 = scalar_lea.vmem [#allocation6], %s2824_s17 }
  0xeb   : > { %s511_s30 = scalar_lea.sflag [#allocation7], %s510_s13 }
  0xec   : > { %2387 = dma.done.wait (%p3082_p6), %s511_s30, 256  }
  0xed   : > { %2389 = vsyncadd (%p3082_p6), %s511_s30, 4294967040  ;;  %s523_s0 = scalar_lea.vmem [#allocation8], %s2824_s17  ;;  %s529_s6 = scalar_lea.sflag [#allocation10], %s510_s13 }
  0xee   : > { %s532_s19 = scalar_lea.vmem [#allocation9], %s2824_s17 }
  0xef   : > { %2391 = dma.done.wait (%p3082_p6), %s529_s6, 128  }
  0xf0   : > { %2393 = vsyncadd (%p3082_p6), %s529_s6, 4294967168  ;;  %p3083_p2 = scmp.eq.s32.totalorder %s2547_s27, 0 }
  0xf2   : > { %2395 = dma.done.wait (%p3083_p2), [#allocation10], 512   ;;  %p3084_p4 = pmov %p3083_p2 }
  0xf3   : > { %p3085_p1 = pmov %p3083_p2 }
  0xf4   : > { %2397 = vsyncadd (%p3084_p4), [#allocation10], 4294966784 }
  0xf5   : > { %2399 = dma.done.wait (%p3085_p1), [#allocation13], 1024   ;;  %p3086_p8 = pmov %p3085_p1 }
  0xf6   : > { %v2439_v0 = vmov 0.0|0.0   ;;  %vm2440_vm0 = vmmov 0   ;;  %v2441_v1 = vmov 0.0   ;;  %v688_v2 = vld [vmem:[#allocation12] sm:$0xff]  ;;  %v689_v3 = vld [vmem:[#allocation12 + $0x8] sm:$0xff]  ;;  %v690_v4 = vld [vmem:[#allocation12 + $0x10] sm:$0xff] }
  0xf7   : > { %2401 = vsyncadd (%p3086_p8), [#allocation13], 4294966272  ;;  %1973 = vmatprep.subr.bf16.mxu1 %v2439_v0  ;;  %1913 = vmatprep.mubr.msk.f32.mxu1 %vm2440_vm0, %v2441_v1  ;;  %v1974_v5 = vpack.c.bf16 %v689_v3, %v688_v2  ;;  %v691_v6 = vld [vmem:[#allocation12 + $0x18] sm:$0xff]  ;;  %v603_v7 = vld [vmem:[#allocation11] sm:$0xff]  ;;  %vm614_vm1 = vcmask 261120   ;;  %s2442_s21 = smov 80  }
  0xf8   : > { %1967 = vmatprep.subr.bf16.mxu0 %v2439_v0  ;;  %1902 = vmatprep.mubr.msk.f32.mxu0 %vm2440_vm0, %v2441_v1  ;;  %v604_v8 = vld [vmem:[#allocation11 + $0x8] sm:$0xff]  ;;  %v605_v9 = vld [vmem:[#allocation11 + $0x10] sm:$0xff]  ;;  %v606_v10 = vld [vmem:[#allocation11 + $0x18] sm:$0xff]  ;;  %v1977_v11 = vpack.c.bf16 %v691_v6, %v690_v4  ;;  %s2443_s16 = smov 112   ;;  %s2444_s10 = smov 96   ;;  %vm858_vm2 = vcmask 130048  }
  0xf9   : > { %1975 = vmatpush3.bf16.msra.mxu1 %v1974_v5  ;;  %v1968_v12 = vpack.c.bf16 %v604_v8, %v603_v7  ;;  %v1971_v13 = vpack.c.bf16 %v606_v10, %v605_v9  ;;  %v601_v14 = vld [vmem:[%s514_s20] sm:$0xff]  ;;  %v600_v15 = vld [vmem:[%s505_s18] sm:$0xff]  ;;  %vm865_vm3 = vcmask 138240   ;;  %s3087_s4 = sld [smem:[#allocation33_spill]]  ;;  %vm942_vm4 = vcmask 64512   ;;  %s2445_s14 = smov 120  }
  0xfa   : > { %1976 = vmatprep.subr.bf16.mxu1 %v2439_v0  ;;  %v1842_v16 = vld [vmem:[%s3018_s7] ss:$0 sm:$0xff]  ;;  %v772_v27 = vld [vmem:[#allocation14] sm:$0xff]  ;;  %v773_v28 = vld [vmem:[#allocation14 + $0x8] sm:$0xff]  ;;  %s2446_s25 = smov 104   ;;  %s2447_s28 = smov 8  }
  0xfb   : > { %1969 = vmatpush3.bf16.msra.mxu0 %v1968_v12  ;;  %v1840_v20 = vld [vmem:[%s3016_s5] ss:$0 sm:$0xff]  ;;  %v774_v29 = vld [vmem:[#allocation14 + $0x10] sm:$0xff]  ;;  %v1980_v30 = vpack.c.bf16 %v773_v28, %v772_v27  ;;  %v602_v39 = vld [vmem:[%s523_s0] sm:$0xff]  ;;  %s2448_s9 = smov 16   ;;  %s2449_s18 = smov 24  }
  0xfc   : > { %1970 = vmatprep.subr.bf16.mxu0 %v2439_v0  ;;  %v775_v31 = vld [vmem:[#allocation14 + $0x18] sm:$0xff]  ;;  %vm1214_vm5 = vcmask 130112   ;;  %vm1398_vm6 = vcmask 195712   ;;  %vm1582_vm7 = vcmask 261312   ;;  %s3088_s20 = sld [smem:[#allocation35_spill]]  ;;  %s3089_s0 = sld [smem:[#allocation23_spill]] }
  0xfd   : > { %1978 = vmatpush3.bf16.msra.mxu1 %v1977_v11  ;;  %v1983_v32 = vpack.c.bf16 %v775_v31, %v774_v29  ;;  %s3090_s6 = sld [smem:[#allocation27_spill]]  ;;  %s3091_s29 = sld [smem:[#allocation34_spill]] }
  0xfe   : > { %1927 = vmatprep.subr.mxu1 %v2441_v1  ;;  %s599_s15 = scalar_lea.vmem [#allocation15], %s2824_s17  ;;  %s3092_s12 = sld [smem:[#allocation36_spill]] }
  0xff   : > { %1972 = vmatpush3.bf16.msra.mxu0 %v1971_v13  ;;  %v1844_v62 = vld [vmem:[%s3087_s4] ss:$0 sm:$0xff]  ;;  %s1627_s4 = scalar_lea.sflag [#allocation5], %s2821_s24  ;;  %s2450_s17 = smov [#allocation15]  }
 0x100   : > { %1914 = vmatmul.mubr.msk.f32.vlgmr.msra.gmra.mrb[0].mxu1 %vm614_vm1, %v601_v14  ;;  %1979 = vmatprep.subr.bf16.mxu0 %v2439_v0 }
 0x101   : > { %1929 = vmatprep.mubr.msk.f32.mxu1 %vm2440_vm0, %v2441_v1 }
 0x102   : > { %1903 = vmatmul.mubr.msk.f32.vlgmr.msra.gmra.mrb[0].mxu0 %vm614_vm1, %v600_v15  ;;  %s1860_s11 = sshll.u32 %s3089_s0, 7 }
 0x103   : > { %1924 = vmatprep.mubr.msk.f32.mxu0 %vm2440_vm0, %v2441_v1  ;;  %1981 = vmatpush3.bf16.msra.mxu0 %v1980_v30  ;;  %p3093_p12 = scmp.ne.s32.totalorder %s3090_s6, 0 }
 0x104   : > { %1982 = vmatprep.subr.bf16.mxu0 %v2439_v0  ;;  %s2961_s1 = scalar_lea.hbm %s3092_s12, %s1860_s11 }
 0x107   : > { %1984 = vmatpush3.bf16.msra.mxu0 %v1983_v32 }
 0x108   : > { %1937 = vmatprep.subr.mxu0 %v2441_v1 }
 0x10a   : > { %1925 = vmatmul.mubr.msk.f32.vlgmr.msra.gmra.mrb[2].mxu0 %vm614_vm1, %v602_v39 }
 0x10b   : > { %1939 = vmatprep.mubr.msk.f32.mxu0 %vm2440_vm0, %v2441_v1 }
 0x1d3   : > { %v768_v17 = vpop.f32.mrb[0].mxu1 }
 0x1d4   : > { %v769_v18 = vadd.f32 %v1842_v16, %v768_v17  ;;  %v1915_v19 = vpop.f32.mrb[1].mxu1 }
 0x1d5   : > { %v684_v21 = vpop.f32.mrb[0].mxu0 }
 0x1d6   : > { %v857_v22 = vmul.f32 %v769_v18, %v769_v18  ;;  %v1904_v23 = vpop.f32.mrb[1].mxu0  ;;  %v685_v24 = vadd.f32 %v1840_v20, %v684_v21 }
 0x1d8   : > { %1400 = vrot.lane.b32.xlu1 %v857_v22, %s2442_s21  ;;  %1029 = vrot.lane.b32.xlu0 %v857_v22, %s2443_s16  ;;  %v856_v25 = vmul.f32 0.17677669, %v685_v24  ;;  %v859_v26 = vsel %vm858_vm2, %v857_v22, 0.0 }
 0x1da   : > { %v862_v45 = vsel %vm858_vm2, %v856_v25, 1.0 }
 0x1dc   : > { %1227 = vrot.lane.b32.xlu1 %v769_v18, %s2444_s10  ;;  %1216 = vrot.lane.b32.xlu0 %v857_v22, %s2444_s10 }
 0x1dd   : > { %v852_v63 = vpop.f32.mrb[2].mxu0 }
 0x1de   : > { %v853_v0 = vadd.f32 %v1844_v62, %v852_v63  ;;  %v1926_v2 = vpop.f32.mrb[3].mxu0 }
 0x1e0   : > { %1042 = vrot.lane.b32.xlu0 %v769_v18, %s2443_s16  ;;  %1036 = vrot.lane.b32.xlu1 %v856_v25, %s2443_s16 }
 0x1e4   : > { %1222 = vrot.lane.b32.xlu0 %v856_v25, %s2444_s10 }
 0x204   : > { %860 = vadd.xlane.f32.xlu1 %v859_v26 }
 0x24a   : > { %v1401_v33 = vpop.permute.xlu1 %1400  ;;  %v1030_v34 = vpop.permute.xlu0 %1029 }
 0x24b   : > { %v1032_v35 = vsel %vm858_vm2, %v1030_v34, 0.0  ;;  %v1403_v36 = vsel %vm858_vm2, %v1401_v33, 0.0 }
 0x24c   : > { %1033 = vadd.xlane.f32.xlu0 %v1032_v35  ;;  %1404 = vadd.xlane.f32.xlu1 %v1403_v36 }
 0x24e   : > { %v1217_v37 = vpop.permute.xlu0 %1216  ;;  %v1228_v40 = vpop.permute.xlu1 %1227 }
 0x24f   : > { %v1219_v38 = vsel %vm858_vm2, %v1217_v37, 0.0 }
 0x250   : > { %1220 = vadd.xlane.f32.xlu0 %v1219_v38 }
 0x252   : > { %v1037_v41 = vpop.permute.xlu1 %1036  ;;  %v1043_v46 = vpop.permute.xlu0 %1042 }
 0x253   : > { %v1039_v54 = vsel %vm858_vm2, %v1037_v41, 1.0 }
 0x256   : > { %v1223_v47 = vpop.permute.xlu0 %1222 }
 0x257   : > { %v1225_v58 = vsel %vm858_vm2, %v1223_v47, 1.0 }
 0x25d   : > { %1411 = vrot.lane.b32.xlu1 %v769_v18, %s2442_s21 }
 0x266   : > { %1406 = vrot.lane.b32.xlu0 %v856_v25, %s2442_s21  ;;  %s1641_s21 = sshll.u32 %s599_s15, 4  ;;  %s2963_s21 = int_to_ptr.vmem [resolvable:$true] %s1641_s21 }
 0x291   : > { %v861_v42 = vpop.xlane.xlu1 %860 }
 0x292   : > { %v863_v43 = vmul.f32 -0.088388346, %v861_v42 }
 0x294   : > { %v864_v44 = vsel %vm858_vm2, %v769_v18, %v863_v43 }
 0x295   : > { %1928 = vmatpush3.xpose.msk.msra.mxu1 %vm865_vm3, %v864_v44 }
 0x296   : > { %1932 = vmatprep.subr.mxu1 %v2441_v1 }
 0x298   : > { %1930 = vmatmul.mubr.msk.f32.vlgmr.msra.gmra.mrb[2].mxu1 %vm865_vm3, %v862_v45 }
 0x299   : > { %1934 = vmatprep.mubr.msk.f32.mxu1 %vm2440_vm0, %v2441_v1  ;;  %1933 = vmatpush3.msra.mxu1 %v853_v0 }
 0x29a   : > { %1942 = vmatprep.subr.mxu1 %v2441_v1 }
 0x2d9   : > { %v1034_v48 = vpop.xlane.xlu0 %1033  ;;  %v1405_v50 = vpop.xlane.xlu1 %1404 }
 0x2da   : > { %v1040_v49 = vmul.f32 -0.088388346, %v1034_v48  ;;  %v1410_v57 = vmul.f32 -0.088388346, %v1405_v50 }
 0x2dc   : > { %v1045_v51 = vsel %vm858_vm2, %v1043_v46, %v1040_v49 }
 0x2dd   : > { %1938 = vmatpush3.xpose.msk.msra.mxu0 %vm865_vm3, %v1045_v51  ;;  %v1221_v52 = vpop.xlane.xlu0 %1220  ;;  %v1412_v56 = vpop.permute.xlu1 %1411 }
 0x2de   : > { %v1226_v53 = vmul.f32 -0.088388346, %v1221_v52  ;;  %1947 = vmatprep.subr.mxu0 %v2441_v1  ;;  %v1414_v59 = vsel %vm858_vm2, %v1412_v56, %v1410_v57 }
 0x2e0   : > { %v1230_v55 = vsel %vm858_vm2, %v1228_v40, %v1226_v53  ;;  %1940 = vmatmul.mubr.msk.f32.vlgmr.msra.gmra.mrb[4].mxu0 %vm865_vm3, %v1039_v54 }
 0x2e1   : > { %1948 = vmatpush3.xpose.msk.msra.mxu0 %vm865_vm3, %v1230_v55  ;;  %1949 = vmatprep.mubr.msk.f32.mxu0 %vm2440_vm0, %v2441_v1  ;;  %v1407_v60 = vpop.permute.xlu0 %1406 }
 0x2e2   : > { %1957 = vmatprep.subr.mxu0 %v2441_v1  ;;  %v1409_v61 = vsel %vm858_vm2, %v1407_v60, 1.0  ;;  %v1585_v60 = vld [vmem:[%s532_s19] sm:$0xff] }
 0x2e4   : > { %1950 = vmatmul.mubr.msk.f32.vlgmr.msra.gmra.mrb[6].mxu0 %vm865_vm3, %v1225_v58 }
 0x2e5   : > { %1958 = vmatpush3.xpose.msk.msra.mxu0 %vm865_vm3, %v1414_v59  ;;  %1959 = vmatprep.mubr.msk.f32.mxu0 %vm2440_vm0, %v2441_v1 }
 0x2e8   : > { %1960 = vmatmul.mubr.msk.f32.vlgmr.msra.gmra.mrb[8].mxu0 %vm865_vm3, %v1409_v61 }
 0x36b   : > { %v938_v3 = vpop.f32.mrb[2].mxu1 }
 0x36c   : > { %v1931_v4 = vpop.f32.mrb[3].mxu1  ;;  %v943_v5 = vsel %vm942_vm4, %v938_v3, -inf }
 0x36d   : > { %944 = vmax.xlane.f32.xlu1 %v943_v5 }
 0x3b3   : > { %v1118_v6 = vpop.f32.mrb[4].mxu0 }
 0x3b4   : > { %v1941_v7 = vpop.f32.mrb[5].mxu0  ;;  %v1122_v8 = vsel %vm942_vm4, %v1118_v6, -inf }
 0x3b5   : > { %1123 = vmax.xlane.f32.xlu0 %v1122_v8  ;;  %v1609_v8 = vlaneseq }
 0x3b7   : > { %v1303_v9 = vpop.f32.mrb[6].mxu0 }
 0x3b8   : > { %v1951_v10 = vpop.f32.mrb[7].mxu0  ;;  %v1307_v11 = vsel %vm942_vm4, %v1303_v9, -inf }
 0x3b9   : > { %1308 = vmax.xlane.f32.xlu0 %v1307_v11  ;;  %v1606_v10 = vld [vmem:[%s3088_s20] sm:$0x1] }
 0x3ba   : > { %v1607_v11 = vand.u32 2147483647, %v1606_v10 }
 0x3bb   : > { %v1487_v12 = vpop.f32.mrb[8].mxu0 }
 0x3bc   : > { %v1961_v13 = vpop.f32.mrb[9].mxu0  ;;  %v1491_v14 = vsel %vm942_vm4, %v1487_v12, -inf }
 0x3bd   : > { %1492 = vmax.xlane.f32.xlu1 %v1491_v14 }
 0x3fa   : > { %v945_v15 = vpop.xlane.xlu1 %944 }
 0x3fb   : > { %v946_v16 = vsub.f32 %v938_v3, %v945_v15 }
 0x3fd   : > { %v947_v17 = vmul.f32 1.442695, %v946_v16 }
 0x3ff   : > { %2106 = vpow2.f32 %v947_v17 }
 0x409   : > { %v2107_v18 = vpop.eup %2106 }
 0x40a   : > { %v949_v19 = vsel %vm942_vm4, %v2107_v18, 0.0 }
 0x40b   : > { %950 = vadd.xlane.f32.xlu0 %v949_v19 }
 0x442   : > { %v1124_v20 = vpop.xlane.xlu0 %1123 }
 0x443   : > { %v1125_v21 = vsub.f32 %v1118_v6, %v1124_v20 }
 0x445   : > { %v1126_v22 = vmul.f32 1.442695, %v1125_v21  ;;  %v1858_v21 = vld [vmem:[%s3091_s29] ss:$0 sm:$0xff] }
 0x446   : > { %v1309_v23 = vpop.xlane.xlu0 %1308 }
 0x447   : > { %2108 = vpow2.f32 %v1126_v22  ;;  %v1310_v24 = vsub.f32 %v1303_v9, %v1309_v23  ;;  %v1610_v9 = vshrl.u32 %v1609_v8, 7 }
 0x449   : > { %v1311_v25 = vmul.f32 1.442695, %v1310_v24 }
 0x44a   : > { %v1493_v30 = vpop.xlane.xlu1 %1492 }
 0x44b   : > { %2110 = vpow2.f32 %v1311_v25  ;;  %v1494_v31 = vsub.f32 %v1487_v12, %v1493_v30  ;;  %v1611_v12 = vsub.s32 0, %v1610_v9 }
 0x44d   : > { %v1495_v32 = vmul.f32 1.442695, %v1494_v31  ;;  %v1612_v16 = vrot.slane %v1607_v11, %v1611_v12 }
 0x44f   : > { %2112 = vpow2.f32 %v1495_v32 }
 0x451   : > { %v2109_v26 = vpop.eup %2108 }
 0x452   : > { %v1128_v27 = vsel %vm942_vm4, %v2109_v26, 0.0 }
 0x453   : > { %1129 = vadd.xlane.f32.xlu1 %v1128_v27 }
 0x455   : > { %v2111_v28 = vpop.eup %2110 }
 0x456   : > { %v1313_v29 = vsel %vm942_vm4, %v2111_v28, 0.0 }
 0x457   : > { %1314 = vadd.xlane.f32.xlu0 %v1313_v29 }
 0x459   : > { %v2113_v33 = vpop.eup %2112 }
 0x45a   : > { %v1497_v34 = vsel %vm942_vm4, %v2113_v33, 0.0 }
 0x464   : > { %1318 = vrot.lane.b32.xlu1 %v853_v0, %s2443_s16 }
 0x46d   : > { %1134 = vrot.lane.b32.xlu0 %v853_v0, %s2445_s14  ;;  %s2330_s14 = scalar_lea.vmem %s2963_s21, 128 }
 0x46e   : > { %p2331_p13 = scmp.ne.s32.totalorder %s2963_s21, %s2330_s14 }
 0x470   : > { %p2332_p3 = pnand %p2331_p13, %p3093_p12 }
 0x472   : > { %p2333_p0 = pneg %p2332_p3 }
 0x488   : > { %1498 = vadd.xlane.f32.xlu1 %v1497_v34 }
 0x498   : > { %v951_v35 = vpop.xlane.xlu0 %950 }
 0x499   : > { %2114 = vrcp.f32 %v951_v35  ;;  %1502 = vrot.lane.b32.xlu1 %v853_v0, %s2446_s25  ;;  %s2334_s25 = sshll.u32 %s2450_s17, 4  ;;  %s2335_s25 = int_to_ptr.vmem [resolvable:$false] %s2334_s25 }
 0x49a   : > { %p2337_p11 = scmp.lt.s32.totalorder %s2963_s21, %s2335_s25 }
 0x4a3   : > { %v2115_v36 = vpop.eup %2114 }
 0x4a4   : > { %v953_v37 = vmul.f32 %v2115_v36, %v2107_v18 }
 0x4a6   : > { %1935 = vmatmul.mubr.msk.f32.vlgmr.msra.gmra.mrb[4].mxu1 %vm942_vm4, %v953_v37 }
 0x4a7   : > { %1944 = vmatprep.mubr.msk.f32.mxu1 %vm2440_vm0, %v2441_v1 }
 0x4e0   : > { %v1130_v38 = vpop.xlane.xlu1 %1129 }
 0x4e1   : > { %2116 = vrcp.f32 %v1130_v38 }
 0x4e4   : > { %v1315_v39 = vpop.xlane.xlu0 %1314  ;;  %v1319_v43 = vpop.permute.xlu1 %1318 }
 0x4e5   : > { %2118 = vrcp.f32 %v1315_v39 }
 0x4e8   : > { %v1135_v40 = vpop.permute.xlu0 %1134 }
 0x4e9   : > { %1943 = vmatpush3.msra.mxu1 %v1135_v40 }
 0x4ea   : > { %1952 = vmatprep.subr.mxu1 %v2441_v1 }
 0x4eb   : > { %v2117_v41 = vpop.eup %2116 }
 0x4ec   : > { %v1132_v42 = vmul.f32 %v2117_v41, %v2109_v26 }
 0x4ee   : > { %1945 = vmatmul.mubr.msk.f32.vlgmr.msra.gmra.mrb[6].mxu1 %vm942_vm4, %v1132_v42 }
 0x4ef   : > { %v2119_v44 = vpop.eup %2118  ;;  %1953 = vmatpush3.msra.mxu1 %v1319_v43  ;;  %1954 = vmatprep.mubr.msk.f32.mxu1 %vm2440_vm0, %v2441_v1 }
 0x4f0   : > { %v1317_v45 = vmul.f32 %v2119_v44, %v2111_v28  ;;  %1962 = vmatprep.subr.mxu1 %v2441_v1 }
 0x4f2   : > { %1955 = vmatmul.mubr.msk.f32.vlgmr.msra.gmra.mrb[8].mxu1 %vm942_vm4, %v1317_v45 }
 0x4f3   : > { %1964 = vmatprep.mubr.msk.f32.mxu1 %vm2440_vm0, %v2441_v1 }
 0x515   : > { %v1499_v46 = vpop.xlane.xlu1 %1498 }
 0x516   : > { %2120 = vrcp.f32 %v1499_v46 }
 0x519   : > { %v1503_v47 = vpop.permute.xlu1 %1502 }
 0x51a   : > { %1963 = vmatpush3.msra.mxu1 %v1503_v47 }
 0x520   : > { %v2121_v48 = vpop.eup %2120 }
 0x521   : > { %v1501_v49 = vmul.f32 %v2121_v48, %v2113_v33 }
 0x523   : > { %1965 = vmatmul.mubr.msk.f32.vlgmr.msra.gmra.mrb[10].mxu1 %vm942_vm4, %v1501_v49 }
 0x579   : > { %v1023_v50 = vpop.f32.mrb[4].mxu1 }
 0x57a   : > { %1027 = vst.msk [vmem:[#allocation2] sm:$0xff] %vm942_vm4, %v1023_v50  ;;  %v1936_v51 = vpop.f32.mrb[5].mxu1 }
 0x5c1   : > { %v1206_v52 = vpop.f32.mrb[6].mxu1 }
 0x5c2   : > { %1211 = vrot.lane.b32.xlu0 %v1206_v52, %s2447_s28  ;;  %v1946_v53 = vpop.f32.mrb[7].mxu1  ;;  %s2336_s28 = scalar_lea.vmem %s2335_s25, 256 }
 0x5c3   : > { %p2338_p9 = scmp.lt.s32.totalorder %s2336_s28, %s2330_s14 }
 0x5c5   : > { %v1390_v54 = vpop.f32.mrb[8].mxu1  ;;  %p2339_p5 = por %p2338_p9, %p2337_p11 }
 0x5c6   : > { %1395 = vrot.lane.b32.xlu1 %v1390_v54, %s2448_s9  ;;  %v1956_v1 = vpop.f32.mrb[9].mxu1 }
 0x5c7   : > { %p2340_p7 = pnand %p2339_p5, %p2333_p0 }
 0x5f6   : > { %v1574_v55 = vpop.f32.mrb[10].mxu1 }
 0x5f7   : > { %1579 = vrot.lane.b32.xlu0 %v1574_v55, %s2449_s18  ;;  %v1966_v56 = vpop.f32.mrb[11].mxu1 }
 0x634   : > { %v1212_v57 = vpop.permute.xlu0 %1211 }
 0x635   : > { %1215 = vst.msk [vmem:[#allocation2] sm:$0xff] %vm1214_vm5, %v1212_v57 }
 0x638   : > { %v1396_v58 = vpop.permute.xlu1 %1395 }
 0x639   : > { %1399 = vst.msk [vmem:[#allocation2] sm:$0xff] %vm1398_vm6, %v1396_v58 }
 0x669   : > { %v1580_v59 = vpop.permute.xlu0 %1579 }
 0x66a   : > { %1583 = vst.msk [vmem:[#allocation2] sm:$0xff] %vm1582_vm7, %v1580_v59 }
 0x671   : > { %v1584_v61 = vld [vmem:[#allocation2] sm:$0xff] }
 0x672   : > { %v1586_v62 = vadd.f32 %v1585_v60, %v1584_v61 }
 0x674   : > { %v1587_v63 = vsel %vm614_vm1, %v1586_v62, 0.0 }
 0x675   : > { %1588 = vadd.xlane.f32.xlu1 %v1587_v63 }
 0x702   : > { %v1589_v0 = vpop.xlane.xlu1 %1588 }
 0x703   : > { %v1591_v2 = vmul.f32 0.03125, %v1589_v0 }
 0x705   : > { %v1592_v3 = vsub.f32 %v1586_v62, %v1591_v2 }
 0x707   : > { %v1593_v4 = vmul.f32 %v1592_v3, %v1592_v3  ;;  %v1622_v22 = vmul.f32 %v1858_v21, %v1592_v3 }
 0x709   : > { %v1594_v5 = vsel %vm614_vm1, %v1593_v4, 0.0 }
 0x70a   : > { %1595 = vadd.xlane.f32.xlu0 %v1594_v5 }
 0x797   : > { %v1596_v6 = vpop.xlane.xlu0 %1595 }
 0x798   : > { %v1597_v7 = vmul.f32 0.032258064, %v1596_v6 }
 0x79a   : > { %2122 = vrsqrt.f32 %v1597_v7  ;;  %vm1600_vm8 = vcmp.eq.f32.partialorder %v1597_v7, inf  ;;  %v1603_v15 = vand.u32 2147483648, %v1597_v7  ;;  %vm1602_vm9 = vcmp.eq.f32.partialorder %v1597_v7, 0.0 }
 0x7a4   : > { %v2123_v13 = vpop.eup %2122 }
 0x7a5   : > { %v1599_v14 = vmul.f32 %v2123_v13, %v1597_v7 }
 0x7a7   : > { %v1601_v17 = vsel %vm1600_vm8, %v1597_v7, %v1599_v14 }
 0x7a8   : > { %v1604_v18 = vsel %vm1602_vm9, %v1603_v15, %v1601_v17 }
 0x7a9   : > { %v1605_v19 = vadd.f32 1e-06, %v1604_v18 }
 0x7ab   : > { %v1614_v20 = vadd.f32 %v1612_v16, %v1605_v19 }
 0x7ad   : > { %2124 = vrcp.f32 %v1614_v20 }
 0x7b7   : > { %v2125_v23 = vpop.eup %2124 }
 0x7b8   : > { %v1624_v24 = vmul.f32 %v2125_v23, %v1622_v22 }
 0x7ba   : > { %1625 = vst.msk [vmem:[%s599_s15] sm:$0xff] %vm614_vm1, %v1624_v24 }
 0x7bb   : > { %2343 = shalt.err (!%p2340_p7)
}
 0x7bc   : > { %s2344_s24 = scalar_lea.hbm %s2961_s1, 128  ;;  %s2348_s13 = scalar_lea.hbm %s3092_s12, 256 }
 0x7bd   : > { %p2345_p10 = scmp.ne.s32.totalorder %s2961_s1, %s2344_s24  ;;  %p2349_p4 = scmp.lt.u32.totalorder %s2961_s1, %s3092_s12 }
 0x7be   : > { %p2350_p1 = scmp.lt.u32.totalorder %s2348_s13, %s2344_s24  ;;  %p2352_p13 = scmp.lt.u32.totalorder %s2344_s24, %s2961_s1 }
 0x7bf   : > { %p2346_p6 = pnand %p2345_p10, %p3093_p12 }
 0x7c0   : > { %p2351_p8 = por %p2350_p1, %p2349_p4 }
 0x7c1   : > { %p2347_p2 = pneg %p2346_p6 }
 0x7c2   : > { %p2353_p3 = por %p2352_p13, %p2351_p8 }
 0x7c4   : > { %p2354_p0 = pnand %p2353_p3, %p2347_p2 }
 0x7c6   : > { %2357 = shalt.err (!%p2354_p0)
}
 0x7c7   : > { %2005 = dma.vmem_to_hbm [thread:$0]  (%p3093_p12), %s2963_s21, 128, %s2961_s1, %s1627_s4  }
 0x7c8 PF: > { %s3094_s0 = sld [smem:[#allocation22_spill]]  ;;  %s3095_s19 = sld [smem:[#allocation25_spill]] }
 0x7c9   : > { %p3097_p9 = scmp.ge.s32.totalorder %s2428_s26, 2 }
 0x7ce   : > { %s1653_s27 = sand.u32 1, %s3094_s0   ;;  %p3096_p11 = scmp.ne.s32.totalorder %s3095_s19, 0 }
 0x7cf   : > { %s1654_s29 = scalar_lea.sflag [#allocation5], %s1653_s27 }
 0x7d0   : > { %p2031_p5 = pnand %p3097_p9, %p3096_p11 }
 0x7d2   : > { %2403 = dma.done.wait (!%p2031_p5), %s1654_s29, 128  }
 0x7d3   : > { %2405 = vsyncadd (!%p2031_p5), %s1654_s29, 4294967168  ;;  %s35_s26 = sadd.s32 1, %s2428_s26   ;;  %s3098_s6 = sld [smem:[#allocation28_spill]] }
 0x7d4   : > { %p32_p7 = scmp.ge.s32.totalorder %s35_s26, 4   ;;  %s3099_s24 = sld [smem:[#allocation24_spill]] }
 0x7d5   : > { %s3100_s25 = sld [smem:[#allocation26_spill]]  ;;  %s3101_s21 = smov %s2412_s22 }
 0x7d6   : > { %s3102_s22 = smov %s2416_s23  ;;  %34 = sbr.rel (!%p32_p7) target bundleno = 20 (0x14), region = 162 }
 0x7d9   : > { %s3103_s23 = smov %s3098_s6 }
 0x7dd   :  { %1659 = vsyncpa [#allocation4], 1 }
 0x7de   :  { %1661 = vsyncpa [#allocation4 + $0x1], 1 }
 0x7df   :  { %1662 = vsyncpa [#allocation7], 1 }
 0x7e0   :  { %1664 = vsyncpa [#allocation7 + $0x1], 1 }
 0x7e1   :  { %1665 = vsyncpa [#allocation10], 1 }
 0x7e2   :  { %1667 = vsyncpa [#allocation10 + $0x1], 1 }
 0x7e3   :  { %1668 = vsyncpa [#allocation13], 1 }
 0x7e4   :  { %1669 = vsyncpa [#allocation5], 1 }
 0x7e5   :  { %1671 = vsyncpa [#allocation5 + $0x1], 1 }

</bundles_post_ra>
